<compile_context>
chip_gen: v6e
topology: v6e:2x2x1
jax: 0.10.0
libtpu: 0.0.40
codegen_flags: <defaults>
</compile_context>

<pallas_src>
import functools
import math

import jax
import jax.numpy as jnp
from jax import lax
from jax.experimental import pallas as pl
from jax.experimental.pallas import tpu as pltpu


_MXU_DTYPE = jnp.bfloat16            # matmul input dtype (f32 accumulation)
_VMEM_LIMIT = 48 * 1024 * 1024       # explicit budget; fits v7x's 64 MiB VMEM


def _pick_tile(dim, preferred, step):
    """Largest multiple of `step` <= `preferred` that divides `dim`, else full dim."""
    if dim <= preferred:
        return dim
    t = (preferred // step) * step
    while t >= step:
        if dim % t == 0:
            return t
        t -= step
    return dim


# ----------------------------- Pallas kernels ------------------------------

def _matmul_bias_kernel(x_ref, w_ref, b_ref, o_ref, acc_ref, *, activation):
    @pl.when(pl.program_id(2) == 0)
    def _():
        acc_ref[...] = jnp.zeros_like(acc_ref)

    acc_ref[...] += jnp.dot(x_ref[...].astype(_MXU_DTYPE),
                            w_ref[...].astype(_MXU_DTYPE),
                            preferred_element_type=jnp.float32)

    @pl.when(pl.program_id(2) == pl.num_programs(2) - 1)
    def _():
        y = acc_ref[...] + b_ref[...]
        if activation == "gelu":
            # gelu (tanh approximation, matches BERT "gelu_new")
            c = math.sqrt(2.0 / math.pi)
            y = 0.5 * y * (1.0 + jnp.tanh(c * (y + 0.044715 * y * y * y)))
        elif activation == "tanh":
            y = jnp.tanh(y)
        o_ref[...] = y.astype(o_ref.dtype)


def matmul_bias(x, w, b, activation=None, *, tm=256, tn=256, tk=512):
    """x: (M, K) f32, w: (K, N) f32, b: (N,) f32 -> (M, N) f32."""
    M, K = x.shape
    N = w.shape[1]
    tm = _pick_tile(M, tm, 8)
    tn = _pick_tile(N, tn, 128)
    tk = _pick_tile(K, tk, 128)
    grid = (M // tm, N // tn, K // tk)
    kern = functools.partial(_matmul_bias_kernel, activation=activation)
    cost = pl.CostEstimate(
        flops=2 * M * N * K,
        transcendentals=(M * N if activation else 0),
        bytes_accessed=4 * (M * K + K * N + M * N + N),
    )
    return pl.pallas_call(
        kern,
        out_shape=jax.ShapeDtypeStruct((M, N), jnp.float32),
        grid=grid,
        in_specs=[
            pl.BlockSpec((tm, tk), lambda i, j, k: (i, k)),
            pl.BlockSpec((tk, tn), lambda i, j, k: (k, j)),
            pl.BlockSpec((1, tn), lambda i, j, k: (0, j)),
        ],
        out_specs=pl.BlockSpec((tm, tn), lambda i, j, k: (i, j)),
        scratch_shapes=[pltpu.VMEM((tm, tn), jnp.float32)],
        compiler_params=pltpu.CompilerParams(
            dimension_semantics=("parallel", "parallel", "arbitrary"),
            vmem_limit_bytes=_VMEM_LIMIT),
        cost_estimate=cost,
    )(x, w, b.reshape(1, N))


def _matmul_bias_add_ln_kernel(x_ref, w_ref, b_ref, r_ref, g_ref, bt_ref,
                               o_ref, acc_ref, *, eps):
    @pl.when(pl.program_id(1) == 0)
    def _():
        acc_ref[...] = jnp.zeros_like(acc_ref)

    acc_ref[...] += jnp.dot(x_ref[...].astype(_MXU_DTYPE),
                            w_ref[...].astype(_MXU_DTYPE),
                            preferred_element_type=jnp.float32)

    @pl.when(pl.program_id(1) == pl.num_programs(1) - 1)
    def _():
        y = acc_ref[...] + b_ref[...] + r_ref[...]
        mean = jnp.mean(y, axis=-1, keepdims=True)
        yc = y - mean
        var = jnp.mean(yc * yc, axis=-1, keepdims=True)
        o_ref[...] = (yc * lax.rsqrt(var + eps) * g_ref[...]
                      + bt_ref[...]).astype(o_ref.dtype)


def matmul_bias_add_layernorm(x, w, b, res, gamma, beta, eps=1e-12,
                              *, tm=256, tk=512):
    """(x @ w + b + res) -> layernorm, fused.  N kept as a single tile so the
    per-row LN statistics are complete in the epilogue (N = hidden, small)."""
    M, K = x.shape
    N = w.shape[1]
    tm = _pick_tile(M, tm, 8)
    tk = _pick_tile(K, tk, 128)
    grid = (M // tm, K // tk)
    kern = functools.partial(_matmul_bias_add_ln_kernel, eps=eps)
    cost = pl.CostEstimate(
        flops=2 * M * N * K + 8 * M * N,
        transcendentals=M,
        bytes_accessed=4 * (M * K + K * N + 3 * M * N),
    )
    return pl.pallas_call(
        kern,
        out_shape=jax.ShapeDtypeStruct((M, N), jnp.float32),
        grid=grid,
        in_specs=[
            pl.BlockSpec((tm, tk), lambda i, k: (i, k)),
            pl.BlockSpec((tk, N), lambda i, k: (k, 0)),
            pl.BlockSpec((1, N), lambda i, k: (0, 0)),
            pl.BlockSpec((tm, N), lambda i, k: (i, 0)),
            pl.BlockSpec((1, N), lambda i, k: (0, 0)),
            pl.BlockSpec((1, N), lambda i, k: (0, 0)),
        ],
        out_specs=pl.BlockSpec((tm, N), lambda i, k: (i, 0)),
        scratch_shapes=[pltpu.VMEM((tm, N), jnp.float32)],
        compiler_params=pltpu.CompilerParams(
            dimension_semantics=("parallel", "arbitrary"),
            vmem_limit_bytes=_VMEM_LIMIT),
        cost_estimate=cost,
    )(x, w, b.reshape(1, N), res, gamma.reshape(1, N), beta.reshape(1, N))


def _layernorm_kernel(x_ref, g_ref, b_ref, o_ref, *, eps):
    x = x_ref[...]
    mean = jnp.mean(x, axis=-1, keepdims=True)
    xc = x - mean
    var = jnp.mean(xc * xc, axis=-1, keepdims=True)
    o_ref[...] = (xc * lax.rsqrt(var + eps) * g_ref[...]
                  + b_ref[...]).astype(o_ref.dtype)


def layernorm(x, gamma, beta, eps=1e-12, *, tm=1024):
    M, H = x.shape
    tm = _pick_tile(M, tm, 8)
    kern = functools.partial(_layernorm_kernel, eps=eps)
    return pl.pallas_call(
        kern,
        out_shape=jax.ShapeDtypeStruct((M, H), jnp.float32),
        grid=(M // tm,),
        in_specs=[
            pl.BlockSpec((tm, H), lambda i: (i, 0)),
            pl.BlockSpec((1, H), lambda i: (0, 0)),
            pl.BlockSpec((1, H), lambda i: (0, 0)),
        ],
        out_specs=pl.BlockSpec((tm, H), lambda i: (i, 0)),
        compiler_params=pltpu.CompilerParams(
            dimension_semantics=("parallel",),
            vmem_limit_bytes=_VMEM_LIMIT),
    )(x, gamma.reshape(1, H), beta.reshape(1, H))


def _attention_kernel(q_ref, kt_ref, v_ref, bias_ref, o_ref, *, scale):
    q = q_ref[0].astype(_MXU_DTYPE)      # (hT, S, D)
    kt = kt_ref[0].astype(_MXU_DTYPE)    # (hT, D, S) -- pre-transposed K
    v = v_ref[0].astype(_MXU_DTYPE)      # (hT, S, D)
    s = jnp.einsum("hqd,hdk->hqk", q, kt,
                   preferred_element_type=jnp.float32)       # (hT, S, S)
    s = s * scale + bias_ref[0]          # bias (1,1,S) broadcasts over heads/rows
    m = jnp.max(s, axis=-1, keepdims=True)
    p = jnp.exp(s - m)
    denom = jnp.sum(p, axis=-1, keepdims=True)
    p = p * pl.reciprocal(denom, approx=True)
    ctx = jnp.einsum("hqk,hkd->hqd", p.astype(_MXU_DTYPE), v,
                     preferred_element_type=jnp.float32)
    o_ref[0] = ctx.astype(o_ref.dtype)


def multihead_attention(q, kt, v, mask_bias, scale):
    """q,v: (B, nH, S, D); kt: (B, nH, D, S); mask_bias: (B, 1, 1, S)."""
    B, nH, S, D = q.shape
    # heads per grid step: amortize per-step overhead while keeping the f32
    # (hT, S, S) score tile well inside VMEM.
    hT = math.gcd(nH, max(1, min(4, (8 * 1024 * 1024) // max(1, S * S * 4))))
    grid = (B, nH // hT)
    kern = functools.partial(_attention_kernel, scale=scale)
    cost = pl.CostEstimate(
        flops=4 * B * nH * S * S * D,
        transcendentals=B * nH * S * S,
        bytes_accessed=4 * (4 * B * nH * S * D + B * S),
    )
    return pl.pallas_call(
        kern,
        out_shape=jax.ShapeDtypeStruct((B, nH, S, D), jnp.float32),
        grid=grid,
        in_specs=[
            pl.BlockSpec((1, hT, S, D), lambda b, h: (b, h, 0, 0)),
            pl.BlockSpec((1, hT, D, S), lambda b, h: (b, h, 0, 0)),
            pl.BlockSpec((1, hT, S, D), lambda b, h: (b, h, 0, 0)),
            pl.BlockSpec((1, 1, 1, S), lambda b, h: (b, 0, 0, 0)),
        ],
        out_specs=pl.BlockSpec((1, hT, S, D), lambda b, h: (b, h, 0, 0)),
        compiler_params=pltpu.CompilerParams(
            dimension_semantics=("parallel", "parallel"),
            vmem_limit_bytes=_VMEM_LIMIT),
        cost_estimate=cost,
    )(q, kt, v, mask_bias)


# ------------------------------- model glue --------------------------------

def init_params(key, *, vocab_size, hidden, num_layers, num_heads,
                intermediate, max_pos, type_vocab, num_labels):
    del num_heads  # layout is head-agnostic; heads are split at runtime

    def nrm(k, shape, std=0.02):
        return (std * jax.random.normal(k, shape)).astype(jnp.float32)

    keys = iter(jax.random.split(key, 8 + 6 * num_layers))
    p = {
        "word_emb": nrm(next(keys), (vocab_size, hidden)),
        "pos_emb": nrm(next(keys), (max_pos, hidden)),
        "type_emb": nrm(next(keys), (type_vocab, hidden)),
        "emb_ln_g": jnp.ones((hidden,), jnp.float32),
        "emb_ln_b": jnp.zeros((hidden,), jnp.float32),
        "pooler_w": nrm(next(keys), (hidden, hidden)),
        "pooler_b": jnp.zeros((hidden,), jnp.float32),
        "cls_w": nrm(next(keys), (hidden, num_labels)),
        "cls_b": jnp.zeros((num_labels,), jnp.float32),
        "layers": [],
    }
    for _ in range(num_layers):
        layer = {
            # fused Q|K|V projection: columns are [q(H) | k(H) | v(H)]
            "qkv_w": nrm(next(keys), (hidden, 3 * hidden)),
            "qkv_b": jnp.zeros((3 * hidden,), jnp.float32),
            "o_w": nrm(next(keys), (hidden, hidden)),
            "o_b": jnp.zeros((hidden,), jnp.float32),
            "ln1_g": jnp.ones((hidden,), jnp.float32),
            "ln1_b": jnp.zeros((hidden,), jnp.float32),
            "i_w": nrm(next(keys), (hidden, intermediate)),
            "i_b": jnp.zeros((intermediate,), jnp.float32),
            "d_w": nrm(next(keys), (intermediate, hidden)),
            "d_b": jnp.zeros((hidden,), jnp.float32),
            "ln2_g": jnp.ones((hidden,), jnp.float32),
            "ln2_b": jnp.zeros((hidden,), jnp.float32),
        }
        p["layers"].append(layer)
    return p


def transformer_layer(p, x, bias_b, B, S, nH, D):
    H = nH * D
    # fused QKV projection: one pass over x from HBM for all three projections
    qkv = matmul_bias(x, p["qkv_w"], p["qkv_b"])                # (B*S, 3H)
    # TODO(synk): fuse the head split/merge transposes into the kernel out_specs
    # so the (B,S,H) activation does not round-trip HBM per layer.
    qkv = qkv.reshape(B, S, 3, nH, D).transpose(2, 0, 3, 1, 4)  # (3, B, nH, S, D)
    q, k, v = qkv[0], qkv[1], qkv[2]
    kt = k.transpose(0, 1, 3, 2)                                # (B, nH, D, S)

    ctx = multihead_attention(q, kt, v, bias_b, 1.0 / math.sqrt(D))
    ctx = ctx.transpose(0, 2, 1, 3).reshape(B * S, H)

    # output projection fused with residual add + layernorm epilogue
    x = matmul_bias_add_layernorm(ctx, p["o_w"], p["o_b"], x,
                                  p["ln1_g"], p["ln1_b"])
    # FFN: up-projection with gelu, down-projection fused with add + layernorm
    ffn = matmul_bias(x, p["i_w"], p["i_b"], activation="gelu")
    x = matmul_bias_add_layernorm(ffn, p["d_w"], p["d_b"], x,
                                  p["ln2_g"], p["ln2_b"])
    return x


def bert_encoder(params, input_ids, input_mask, num_heads):
    B, S = input_ids.shape
    H = params["word_emb"].shape[1]
    nH = num_heads
    D = H // nH

    # embeddings (gather is plain-JAX glue), then tiled Pallas layernorm
    emb = (params["word_emb"][input_ids]
           + params["pos_emb"][jnp.arange(S)][None, :, :]
           + params["type_emb"][0][None, None, :])              # (B, S, H)
    x = layernorm(emb.reshape(B * S, H), params["emb_ln_g"], params["emb_ln_b"])

    # additive attention-mask bias kept at (B,1,1,S); broadcast over heads
    # happens inside the attention BlockSpec (no per-head HBM replication).
    bias_b = ((1.0 - input_mask.astype(jnp.float32)) * -10000.0)[:, None, None, :]

    for layer in params["layers"]:
        x = transformer_layer(layer, x, bias_b, B, S, nH, D)

    hidden = x.reshape(B, S, H)
    cls_tok = hidden[:, 0, :]                                   # (B, H)
    pooled = matmul_bias(cls_tok, params["pooler_w"], params["pooler_b"],
                         activation="tanh")                     # (B, H)
    return hidden, pooled


def bert_finetune_forward(params, input_ids, input_mask, labels=None, *,
                          num_heads, training=False):
    """Mirrors BertFineTuneModel.forward: returns (logits, loss, accuracy)."""
    _, pooled = bert_encoder(params, input_ids, input_mask, num_heads)
    # dropout: identity in eval mode
    logits = matmul_bias(pooled, params["cls_w"], params["cls_b"])  # (B, labels)
    loss, acc = 0.0, 0.0
    if training and labels is not None:
        logp = jax.nn.log_softmax(logits, axis=-1)
        loss = -jnp.mean(jnp.take_along_axis(logp, labels[:, None], axis=-1))
        acc = jnp.mean((jnp.argmax(logits, axis=-1) == labels).astype(jnp.float32))
    return logits, loss, acc


# ---------------------------------- main ------------------------------------

if __name__ == "__main__":
    B, S = 2, 8
    HIDDEN, N_HEADS, N_LAYERS, INTER = 32, 2, 2, 64
    VOCAB, MAX_POS, TYPE_VOCAB, NUM_LABELS = 100, 16, 2, 3

    key = jax.random.PRNGKey(0)
    k_param, k_ids = jax.random.split(key)

    params = init_params(k_param, vocab_size=VOCAB, hidden=HIDDEN,
                         num_layers=N_LAYERS, num_heads=N_HEADS,
                         intermediate=INTER, max_pos=MAX_POS,
                         type_vocab=TYPE_VOCAB, num_labels=NUM_LABELS)

    input_ids = jax.random.randint(k_ids, (B, S), 0, VOCAB, dtype=jnp.int32)
    input_mask = jnp.array([[1] * S,
                            [1] * (S - 2) + [0] * 2], dtype=jnp.int32)

    fwd = jax.jit(functools.partial(bert_finetune_forward, num_heads=N_HEADS))
    logits, loss, acc = fwd(params, input_ids, input_mask)
    jax.block_until_ready(logits)

    assert logits.shape == (B, NUM_LABELS)
    assert logits.dtype == jnp.float32
    print("KERNEL_OK")
</pallas_src>

<mosaic_0001>
module attributes {stable_mosaic.version = 11 : i64} {
  func.func @_matmul_bias_kernel(%arg0: i32, %arg1: i32, %arg2: i32, %arg3: memref<16x32xf32, #tpu.memory_space<vmem>>, %arg4: memref<32x96xf32, #tpu.memory_space<vmem>>, %arg5: memref<1x96xf32, #tpu.memory_space<vmem>>, %arg6: memref<16x96xf32, #tpu.memory_space<vmem>>, %arg7: memref<16x96xf32, #tpu.memory_space<vmem>>) attributes {dimension_semantics = [#tpu.dimension_semantics<parallel>, #tpu.dimension_semantics<parallel>, #tpu.dimension_semantics<arbitrary>], iteration_bounds = array<i64: 1, 1, 1>, scalar_prefetch = 0 : i64, scratch_operands = 1 : i64, tpu.core_type = #tpu.core_type<tc>, window_params = [{transform_indices = @transform_0, window_bounds = array<i64: 16, 32>}, {transform_indices = @transform_1, window_bounds = array<i64: 32, 96>}, {transform_indices = @transform_2, window_bounds = array<i64: 1, 96>}, {transform_indices = @transform_3, window_bounds = array<i64: 16, 96>}]} {
    %c0_i32 = arith.constant 0 : i32
    %0 = arith.cmpi eq, %arg2, %c0_i32 : i32
    %1 = arith.extui %0 : i1 to i32
    %c0_i32_0 = arith.constant 0 : i32
    %2 = arith.cmpi ne, %1, %c0_i32_0 : i32
    scf.if %2 {
      %cst_10 = arith.constant 0.000000e+00 : f32
      %14 = vector.broadcast %cst_10 : f32 to vector<16x96xf32>
      %c0_11 = arith.constant 0 : index
      %c0_12 = arith.constant 0 : index
      %15 = vector.load %arg7[%c0_11, %c0_12] : memref<16x96xf32, #tpu.memory_space<vmem>>, vector<16x96xf32>
      tpu.vector_store %arg7[%c0_11, %c0_12], %14 {strides = array<i32>} : memref<16x96xf32, #tpu.memory_space<vmem>>, vector<16x96xf32>,
    } else {
    }
    %c0 = arith.constant 0 : index
    %c0_1 = arith.constant 0 : index
    %3 = vector.load %arg7[%c0, %c0_1] : memref<16x96xf32, #tpu.memory_space<vmem>>, vector<16x96xf32>
    %c0_2 = arith.constant 0 : index
    %c0_3 = arith.constant 0 : index
    %4 = vector.load %arg3[%c0_2, %c0_3] : memref<16x32xf32, #tpu.memory_space<vmem>>, vector<16x32xf32>
    %5 = arith.truncf %4 : vector<16x32xf32> to vector<16x32xbf16>
    %c0_4 = arith.constant 0 : index
    %c0_5 = arith.constant 0 : index
    %6 = vector.load %arg4[%c0_4, %c0_5] : memref<32x96xf32, #tpu.memory_space<vmem>>, vector<32x96xf32>
    %7 = arith.truncf %6 : vector<32x96xf32> to vector<32x96xbf16>
    %cst = arith.constant dense<0.000000e+00> : vector<16x96xf32>
    %8 = tpu.matmul %5, %7, %cst {dimension_numbers = #tpu.dot_dimension_numbers<[1], [0], [0], [1], [0, 0, 1, 1], [], []>} : vector<16x32xbf16>, vector<32x96xbf16>, vector<16x96xf32> -> vector<16x96xf32>
    %9 = arith.addf %3, %8 : vector<16x96xf32>
    %c0_6 = arith.constant 0 : index
    %c0_7 = arith.constant 0 : index
    %10 = vector.load %arg7[%c0_6, %c0_7] : memref<16x96xf32, #tpu.memory_space<vmem>>, vector<16x96xf32>
    tpu.vector_store %arg7[%c0_6, %c0_7], %9 {strides = array<i32>} : memref<16x96xf32, #tpu.memory_space<vmem>>, vector<16x96xf32>,
    %c0_i32_8 = arith.constant 0 : i32
    %11 = arith.cmpi eq, %arg2, %c0_i32_8 : i32
    %12 = arith.extui %11 : i1 to i32
    %c0_i32_9 = arith.constant 0 : i32
    %13 = arith.cmpi ne, %12, %c0_i32_9 : i32
    scf.if %13 {
      %c0_10 = arith.constant 0 : index
      %c0_11 = arith.constant 0 : index
      %14 = vector.load %arg7[%c0_10, %c0_11] : memref<16x96xf32, #tpu.memory_space<vmem>>, vector<16x96xf32>
      %c0_12 = arith.constant 0 : index
      %c0_13 = arith.constant 0 : index
      %15 = vector.load %arg5[%c0_12, %c0_13] : memref<1x96xf32, #tpu.memory_space<vmem>>, vector<1x96xf32>
      %16 = vector.broadcast %15 : vector<1x96xf32> to vector<16x96xf32>
      %17 = arith.addf %14, %16 : vector<16x96xf32>
      %c0_14 = arith.constant 0 : index
      %c0_15 = arith.constant 0 : index
      %18 = vector.load %arg6[%c0_14, %c0_15] : memref<16x96xf32, #tpu.memory_space<vmem>>, vector<16x96xf32>
      tpu.vector_store %arg6[%c0_14, %c0_15], %17 {strides = array<i32>} : memref<16x96xf32, #tpu.memory_space<vmem>>, vector<16x96xf32>,
    } else {
    }
    return
  }
  func.func @transform_0(%arg0: i32, %arg1: i32, %arg2: i32) -> (i32, i32) {
    %c0_i32 = arith.constant 0 : i32
    return %arg0, %arg2 : i32, i32
  }
  func.func @transform_1(%arg0: i32, %arg1: i32, %arg2: i32) -> (i32, i32) {
    %c0_i32 = arith.constant 0 : i32
    return %arg2, %arg1 : i32, i32
  }
  func.func @transform_2(%arg0: i32, %arg1: i32, %arg2: i32) -> (i32, i32) {
    %c0_i32 = arith.constant 0 : i32
    %c0_i32_0 = arith.constant 0 : i32
    return %c0_i32, %arg1 : i32, i32
  }
  func.func @transform_3(%arg0: i32, %arg1: i32, %arg2: i32) -> (i32, i32) {
    %c0_i32 = arith.constant 0 : i32
    return %arg0, %arg1 : i32, i32
  }
}

module attributes {stable_mosaic.version = 11 : i64} {
  func.func @_layernorm_kernel(%arg0: i32, %arg1: memref<16x32xf32, #tpu.memory_space<vmem>>, %arg2: memref<1x32xf32, #tpu.memory_space<vmem>>, %arg3: memref<1x32xf32, #tpu.memory_space<vmem>>, %arg4: memref<16x32xf32, #tpu.memory_space<vmem>>) attributes {dimension_semantics = [#tpu.dimension_semantics<parallel>], iteration_bounds = array<i64: 1>, scalar_prefetch = 0 : i64, scratch_operands = 0 : i64, tpu.core_type = #tpu.core_type<tc>, window_params = [{transform_indices = @transform_0, window_bounds = array<i64: 16, 32>}, {pipeline_mode = #tpu.pipeline_mode<synchronous>, transform_indices = @transform_1, window_bounds = array<i64: 1, 32>}, {pipeline_mode = #tpu.pipeline_mode<synchronous>, transform_indices = @transform_2, window_bounds = array<i64: 1, 32>}, {transform_indices = @transform_3, window_bounds = array<i64: 16, 32>}]} {
    %c0 = arith.constant 0 : index
    %c0_0 = arith.constant 0 : index
    %0 = vector.load %arg1[%c0, %c0_0] : memref<16x32xf32, #tpu.memory_space<vmem>>, vector<16x32xf32>
    %cst = arith.constant dense<0.000000e+00> : vector<16xf32>
    %1 = vector.multi_reduction <add>, %0, %cst [1] : vector<16x32xf32> to vector<16xf32>
    %2 = vector.shape_cast %1 : vector<16xf32> to vector<16x1xf32>
    %cst_1 = arith.constant 3.200000e+01 : f32
    %3 = vector.broadcast %cst_1 : f32 to vector<16x1xf32>
    %4 = arith.divf %2, %3 : vector<16x1xf32>
    %5 = vector.broadcast %4 : vector<16x1xf32> to vector<16x32xf32>
    %6 = arith.subf %0, %5 : vector<16x32xf32>
    %7 = arith.mulf %6, %6 : vector<16x32xf32>
    %cst_2 = arith.constant dense<0.000000e+00> : vector<16xf32>
    %8 = vector.multi_reduction <add>, %7, %cst_2 [1] : vector<16x32xf32> to vector<16xf32>
    %9 = vector.shape_cast %8 : vector<16xf32> to vector<16x1xf32>
    %cst_3 = arith.constant 3.200000e+01 : f32
    %10 = vector.broadcast %cst_3 : f32 to vector<16x1xf32>
    %11 = arith.divf %9, %10 : vector<16x1xf32>
    %cst_4 = arith.constant 9.99999996E-13 : f32
    %12 = vector.broadcast %cst_4 : f32 to vector<16x1xf32>
    %13 = arith.addf %11, %12 : vector<16x1xf32>
    %14 = math.rsqrt %13 : vector<16x1xf32>
    %15 = vector.broadcast %14 : vector<16x1xf32> to vector<16x32xf32>
    %16 = arith.mulf %6, %15 : vector<16x32xf32>
    %c0_5 = arith.constant 0 : index
    %c0_6 = arith.constant 0 : index
    %17 = vector.load %arg2[%c0_5, %c0_6] : memref<1x32xf32, #tpu.memory_space<vmem>>, vector<1x32xf32>
    %18 = vector.broadcast %17 : vector<1x32xf32> to vector<16x32xf32>
    %19 = arith.mulf %16, %18 : vector<16x32xf32>
    %c0_7 = arith.constant 0 : index
    %c0_8 = arith.constant 0 : index
    %20 = vector.load %arg3[%c0_7, %c0_8] : memref<1x32xf32, #tpu.memory_space<vmem>>, vector<1x32xf32>
    %21 = vector.broadcast %20 : vector<1x32xf32> to vector<16x32xf32>
    %22 = arith.addf %19, %21 : vector<16x32xf32>
    %c0_9 = arith.constant 0 : index
    %c0_10 = arith.constant 0 : index
    %23 = vector.load %arg4[%c0_9, %c0_10] : memref<16x32xf32, #tpu.memory_space<vmem>>, vector<16x32xf32>
    tpu.vector_store %arg4[%c0_9, %c0_10], %22 {strides = array<i32>} : memref<16x32xf32, #tpu.memory_space<vmem>>, vector<16x32xf32>,
    return
  }
  func.func @transform_0(%arg0: i32) -> (i32, i32) {
    %c0_i32 = arith.constant 0 : i32
    %c0_i32_0 = arith.constant 0 : i32
    return %arg0, %c0_i32 : i32, i32
  }
  func.func @transform_1(%arg0: i32) -> (i32, i32) {
    %c0_i32 = arith.constant 0 : i32
    %c0_i32_0 = arith.constant 0 : i32
    %c0_i32_1 = arith.constant 0 : i32
    return %c0_i32, %c0_i32_0 : i32, i32
  }
  func.func @transform_2(%arg0: i32) -> (i32, i32) {
    %c0_i32 = arith.constant 0 : i32
    %c0_i32_0 = arith.constant 0 : i32
    %c0_i32_1 = arith.constant 0 : i32
    return %c0_i32, %c0_i32_0 : i32, i32
  }
  func.func @transform_3(%arg0: i32) -> (i32, i32) {
    %c0_i32 = arith.constant 0 : i32
    %c0_i32_0 = arith.constant 0 : i32
    return %arg0, %c0_i32 : i32, i32
  }
}

module attributes {stable_mosaic.version = 11 : i64} {
  func.func @_attention_kernel(%arg0: i32, %arg1: i32, %arg2: memref<1x2x8x16xf32, #tpu.memory_space<vmem>>, %arg3: memref<1x2x16x8xf32, #tpu.memory_space<vmem>>, %arg4: memref<1x2x8x16xf32, #tpu.memory_space<vmem>>, %arg5: memref<1x1x1x8xf32, #tpu.memory_space<vmem>>, %arg6: memref<1x2x8x16xf32, #tpu.memory_space<vmem>>) attributes {dimension_semantics = [#tpu.dimension_semantics<parallel>, #tpu.dimension_semantics<parallel>], iteration_bounds = array<i64: 2, 1>, scalar_prefetch = 0 : i64, scratch_operands = 0 : i64, tpu.core_type = #tpu.core_type<tc>, window_params = [{transform_indices = @transform_0, window_bounds = array<i64: 1, 2, 8, 16>}, {transform_indices = @transform_1, window_bounds = array<i64: 1, 2, 16, 8>}, {transform_indices = @transform_2, window_bounds = array<i64: 1, 2, 8, 16>}, {transform_indices = @transform_3, window_bounds = array<i64: 1, 1, 1, 8>}, {transform_indices = @transform_4, window_bounds = array<i64: 1, 2, 8, 16>}]} {
    %c0 = arith.constant 0 : index
    %c0_0 = arith.constant 0 : index
    %c0_1 = arith.constant 0 : index
    %c0_2 = arith.constant 0 : index
    %0 = vector.load %arg2[%c0, %c0_0, %c0_1, %c0_2] : memref<1x2x8x16xf32, #tpu.memory_space<vmem>>, vector<1x2x8x16xf32>
    %1 = vector.shape_cast %0 : vector<1x2x8x16xf32> to vector<2x8x16xf32>
    %2 = arith.truncf %1 : vector<2x8x16xf32> to vector<2x8x16xbf16>
    %c0_3 = arith.constant 0 : index
    %c0_4 = arith.constant 0 : index
    %c0_5 = arith.constant 0 : index
    %c0_6 = arith.constant 0 : index
    %3 = vector.load %arg3[%c0_3, %c0_4, %c0_5, %c0_6] : memref<1x2x16x8xf32, #tpu.memory_space<vmem>>, vector<1x2x16x8xf32>
    %4 = vector.shape_cast %3 : vector<1x2x16x8xf32> to vector<2x16x8xf32>
    %5 = arith.truncf %4 : vector<2x16x8xf32> to vector<2x16x8xbf16>
    %c0_7 = arith.constant 0 : index
    %c0_8 = arith.constant 0 : index
    %c0_9 = arith.constant 0 : index
    %c0_10 = arith.constant 0 : index
    %6 = vector.load %arg4[%c0_7, %c0_8, %c0_9, %c0_10] : memref<1x2x8x16xf32, #tpu.memory_space<vmem>>, vector<1x2x8x16xf32>
    %7 = vector.shape_cast %6 : vector<1x2x8x16xf32> to vector<2x8x16xf32>
    %8 = arith.truncf %7 : vector<2x8x16xf32> to vector<2x8x16xbf16>
    "tpu.trace_start"() <{level = 10 : i32, message = "hqd,hdk->hqk"}> : () -> ()
    %cst = arith.constant dense<0.000000e+00> : vector<2x8x8xf32>
    %9 = tpu.matmul %2, %5, %cst {dimension_numbers = #tpu.dot_dimension_numbers<[2], [1], [1], [2], [0, 0, 0, 1, 1, 2], [0], [0]>} : vector<2x8x16xbf16>, vector<2x16x8xbf16>, vector<2x8x8xf32> -> vector<2x8x8xf32>
    "tpu.trace_stop"() : () -> ()
    %cst_11 = arith.constant 2.500000e-01 : f32
    %10 = vector.broadcast %cst_11 : f32 to vector<2x8x8xf32>
    %11 = arith.mulf %9, %10 : vector<2x8x8xf32>
    %c0_12 = arith.constant 0 : index
    %c0_13 = arith.constant 0 : index
    %c0_14 = arith.constant 0 : index
    %c0_15 = arith.constant 0 : index
    %12 = vector.load %arg5[%c0_12, %c0_13, %c0_14, %c0_15] : memref<1x1x1x8xf32, #tpu.memory_space<vmem>>, vector<1x1x1x8xf32>
    %13 = vector.shape_cast %12 : vector<1x1x1x8xf32> to vector<1x1x8xf32>
    %14 = vector.broadcast %13 : vector<1x1x8xf32> to vector<2x8x8xf32>
    %15 = arith.addf %11, %14 : vector<2x8x8xf32>
    %cst_16 = arith.constant dense<0xFF800000> : vector<2x8xf32>
    %16 = vector.multi_reduction <maximumf>, %15, %cst_16 [2] : vector<2x8x8xf32> to vector<2x8xf32>
    %17 = vector.shape_cast %16 : vector<2x8xf32> to vector<2x8x1xf32>
    %18 = vector.broadcast %17 : vector<2x8x1xf32> to vector<2x8x8xf32>
    %19 = arith.subf %15, %18 : vector<2x8x8xf32>
    %20 = math.exp %19 : vector<2x8x8xf32>
    %cst_17 = arith.constant dense<0.000000e+00> : vector<2x8xf32>
    %21 = vector.multi_reduction <add>, %20, %cst_17 [2] : vector<2x8x8xf32> to vector<2x8xf32>
    %22 = vector.shape_cast %21 : vector<2x8xf32> to vector<2x8x1xf32>
    %23 = tpu.reciprocal %22 {approx = true} : vector<2x8x1xf32> -> vector<2x8x1xf32>
    %24 = vector.broadcast %23 : vector<2x8x1xf32> to vector<2x8x8xf32>
    %25 = arith.mulf %20, %24 : vector<2x8x8xf32>
    %26 = arith.truncf %25 : vector<2x8x8xf32> to vector<2x8x8xbf16>
    "tpu.trace_start"() <{level = 10 : i32, message = "hqk,hkd->hqd"}> : () -> ()
    %cst_18 = arith.constant dense<0.000000e+00> : vector<2x8x16xf32>
    %27 = tpu.matmul %26, %8, %cst_18 {dimension_numbers = #tpu.dot_dimension_numbers<[2], [1], [1], [2], [0, 0, 0, 1, 1, 2], [0], [0]>} : vector<2x8x8xbf16>, vector<2x8x16xbf16>, vector<2x8x16xf32> -> vector<2x8x16xf32>
    "tpu.trace_stop"() : () -> ()
    %c0_19 = arith.constant 0 : index
    %c0_20 = arith.constant 0 : index
    %c0_21 = arith.constant 0 : index
    %c0_22 = arith.constant 0 : index
    %28 = vector.load %arg6[%c0_19, %c0_20, %c0_21, %c0_22] : memref<1x2x8x16xf32, #tpu.memory_space<vmem>>, vector<1x2x8x16xf32>
    %29 = vector.shape_cast %28 : vector<1x2x8x16xf32> to vector<2x8x16xf32>
    %30 = vector.shape_cast %27 : vector<2x8x16xf32> to vector<1x2x8x16xf32>
    tpu.vector_store %arg6[%c0_19, %c0_20, %c0_21, %c0_22], %30 {strides = array<i32>} : memref<1x2x8x16xf32, #tpu.memory_space<vmem>>, vector<1x2x8x16xf32>,
    return
  }
  func.func @transform_0(%arg0: i32, %arg1: i32) -> (i32, i32, i32, i32) {
    %c0_i32 = arith.constant 0 : i32
    %c0_i32_0 = arith.constant 0 : i32
    %c0_i32_1 = arith.constant 0 : i32
    return %arg0, %arg1, %c0_i32, %c0_i32_0 : i32, i32, i32, i32
  }
  func.func @transform_1(%arg0: i32, %arg1: i32) -> (i32, i32, i32, i32) {
    %c0_i32 = arith.constant 0 : i32
    %c0_i32_0 = arith.constant 0 : i32
    %c0_i32_1 = arith.constant 0 : i32
    return %arg0, %arg1, %c0_i32, %c0_i32_0 : i32, i32, i32, i32
  }
  func.func @transform_2(%arg0: i32, %arg1: i32) -> (i32, i32, i32, i32) {
    %c0_i32 = arith.constant 0 : i32
    %c0_i32_0 = arith.constant 0 : i32
    %c0_i32_1 = arith.constant 0 : i32
    return %arg0, %arg1, %c0_i32, %c0_i32_0 : i32, i32, i32, i32
  }
  func.func @transform_3(%arg0: i32, %arg1: i32) -> (i32, i32, i32, i32) {
    %c0_i32 = arith.constant 0 : i32
    %c0_i32_0 = arith.constant 0 : i32
    %c0_i32_1 = arith.constant 0 : i32
    %c0_i32_2 = arith.constant 0 : i32
    return %arg0, %c0_i32, %c0_i32_0, %c0_i32_1 : i32, i32, i32, i32
  }
  func.func @transform_4(%arg0: i32, %arg1: i32) -> (i32, i32, i32, i32) {
    %c0_i32 = arith.constant 0 : i32
    %c0_i32_0 = arith.constant 0 : i32
    %c0_i32_1 = arith.constant 0 : i32
    return %arg0, %arg1, %c0_i32, %c0_i32_0 : i32, i32, i32, i32
  }
}

module attributes {stable_mosaic.version = 11 : i64} {
  func.func @_matmul_bias_add_ln_kernel(%arg0: i32, %arg1: i32, %arg2: memref<16x32xf32, #tpu.memory_space<vmem>>, %arg3: memref<32x32xf32, #tpu.memory_space<vmem>>, %arg4: memref<1x32xf32, #tpu.memory_space<vmem>>, %arg5: memref<16x32xf32, #tpu.memory_space<vmem>>, %arg6: memref<1x32xf32, #tpu.memory_space<vmem>>, %arg7: memref<1x32xf32, #tpu.memory_space<vmem>>, %arg8: memref<16x32xf32, #tpu.memory_space<vmem>>, %arg9: memref<16x32xf32, #tpu.memory_space<vmem>>) attributes {dimension_semantics = [#tpu.dimension_semantics<parallel>, #tpu.dimension_semantics<arbitrary>], iteration_bounds = array<i64: 1, 1>, scalar_prefetch = 0 : i64, scratch_operands = 1 : i64, tpu.core_type = #tpu.core_type<tc>, window_params = [{transform_indices = @transform_0, window_bounds = array<i64: 16, 32>}, {transform_indices = @transform_1, window_bounds = array<i64: 32, 32>}, {pipeline_mode = #tpu.pipeline_mode<synchronous>, transform_indices = @transform_2, window_bounds = array<i64: 1, 32>}, {transform_indices = @transform_3, window_bounds = array<i64: 16, 32>}, {pipeline_mode = #tpu.pipeline_mode<synchronous>, transform_indices = @transform_4, window_bounds = array<i64: 1, 32>}, {pipeline_mode = #tpu.pipeline_mode<synchronous>, transform_indices = @transform_5, window_bounds = array<i64: 1, 32>}, {transform_indices = @transform_6, window_bounds = array<i64: 16, 32>}]} {
    %c0_i32 = arith.constant 0 : i32
    %0 = arith.cmpi eq, %arg1, %c0_i32 : i32
    %1 = arith.extui %0 : i1 to i32
    %c0_i32_0 = arith.constant 0 : i32
    %2 = arith.cmpi ne, %1, %c0_i32_0 : i32
    scf.if %2 {
      %cst_10 = arith.constant 0.000000e+00 : f32
      %14 = vector.broadcast %cst_10 : f32 to vector<16x32xf32>
      %c0_11 = arith.constant 0 : index
      %c0_12 = arith.constant 0 : index
      %15 = vector.load %arg9[%c0_11, %c0_12] : memref<16x32xf32, #tpu.memory_space<vmem>>, vector<16x32xf32>
      tpu.vector_store %arg9[%c0_11, %c0_12], %14 {strides = array<i32>} : memref<16x32xf32, #tpu.memory_space<vmem>>, vector<16x32xf32>,
    } else {
    }
    %c0 = arith.constant 0 : index
    %c0_1 = arith.constant 0 : index
    %3 = vector.load %arg9[%c0, %c0_1] : memref<16x32xf32, #tpu.memory_space<vmem>>, vector<16x32xf32>
    %c0_2 = arith.constant 0 : index
    %c0_3 = arith.constant 0 : index
    %4 = vector.load %arg2[%c0_2, %c0_3] : memref<16x32xf32, #tpu.memory_space<vmem>>, vector<16x32xf32>
    %5 = arith.truncf %4 : vector<16x32xf32> to vector<16x32xbf16>
    %c0_4 = arith.constant 0 : index
    %c0_5 = arith.constant 0 : index
    %6 = vector.load %arg3[%c0_4, %c0_5] : memref<32x32xf32, #tpu.memory_space<vmem>>, vector<32x32xf32>
    %7 = arith.truncf %6 : vector<32x32xf32> to vector<32x32xbf16>
    %cst = arith.constant dense<0.000000e+00> : vector<16x32xf32>
    %8 = tpu.matmul %5, %7, %cst {dimension_numbers = #tpu.dot_dimension_numbers<[1], [0], [0], [1], [0, 0, 1, 1], [], []>} : vector<16x32xbf16>, vector<32x32xbf16>, vector<16x32xf32> -> vector<16x32xf32>
    %9 = arith.addf %3, %8 : vector<16x32xf32>
    %c0_6 = arith.constant 0 : index
    %c0_7 = arith.constant 0 : index
    %10 = vector.load %arg9[%c0_6, %c0_7] : memref<16x32xf32, #tpu.memory_space<vmem>>, vector<16x32xf32>
    tpu.vector_store %arg9[%c0_6, %c0_7], %9 {strides = array<i32>} : memref<16x32xf32, #tpu.memory_space<vmem>>, vector<16x32xf32>,
    %c0_i32_8 = arith.constant 0 : i32
    %11 = arith.cmpi eq, %arg1, %c0_i32_8 : i32
    %12 = arith.extui %11 : i1 to i32
    %c0_i32_9 = arith.constant 0 : i32
    %13 = arith.cmpi ne, %12, %c0_i32_9 : i32
    scf.if %13 {
      %c0_10 = arith.constant 0 : index
      %c0_11 = arith.constant 0 : index
      %14 = vector.load %arg9[%c0_10, %c0_11] : memref<16x32xf32, #tpu.memory_space<vmem>>, vector<16x32xf32>
      %c0_12 = arith.constant 0 : index
      %c0_13 = arith.constant 0 : index
      %15 = vector.load %arg4[%c0_12, %c0_13] : memref<1x32xf32, #tpu.memory_space<vmem>>, vector<1x32xf32>
      %16 = vector.broadcast %15 : vector<1x32xf32> to vector<16x32xf32>
      %17 = arith.addf %14, %16 : vector<16x32xf32>
      %c0_14 = arith.constant 0 : index
      %c0_15 = arith.constant 0 : index
      %18 = vector.load %arg5[%c0_14, %c0_15] : memref<16x32xf32, #tpu.memory_space<vmem>>, vector<16x32xf32>
      %19 = arith.addf %17, %18 : vector<16x32xf32>
      %cst_16 = arith.constant dense<0.000000e+00> : vector<16xf32>
      %20 = vector.multi_reduction <add>, %19, %cst_16 [1] : vector<16x32xf32> to vector<16xf32>
      %21 = vector.shape_cast %20 : vector<16xf32> to vector<16x1xf32>
      %cst_17 = arith.constant 3.200000e+01 : f32
      %22 = vector.broadcast %cst_17 : f32 to vector<16x1xf32>
      %23 = arith.divf %21, %22 : vector<16x1xf32>
      %24 = vector.broadcast %23 : vector<16x1xf32> to vector<16x32xf32>
      %25 = arith.subf %19, %24 : vector<16x32xf32>
      %26 = arith.mulf %25, %25 : vector<16x32xf32>
      %cst_18 = arith.constant dense<0.000000e+00> : vector<16xf32>
      %27 = vector.multi_reduction <add>, %26, %cst_18 [1] : vector<16x32xf32> to vector<16xf32>
      %28 = vector.shape_cast %27 : vector<16xf32> to vector<16x1xf32>
      %cst_19 = arith.constant 3.200000e+01 : f32
      %29 = vector.broadcast %cst_19 : f32 to vector<16x1xf32>
      %30 = arith.divf %28, %29 : vector<16x1xf32>
      %cst_20 = arith.constant 9.99999996E-13 : f32
      %31 = vector.broadcast %cst_20 : f32 to vector<16x1xf32>
      %32 = arith.addf %30, %31 : vector<16x1xf32>
      %33 = math.rsqrt %32 : vector<16x1xf32>
      %34 = vector.broadcast %33 : vector<16x1xf32> to vector<16x32xf32>
      %35 = arith.mulf %25, %34 : vector<16x32xf32>
      %c0_21 = arith.constant 0 : index
      %c0_22 = arith.constant 0 : index
      %36 = vector.load %arg6[%c0_21, %c0_22] : memref<1x32xf32, #tpu.memory_space<vmem>>, vector<1x32xf32>
      %37 = vector.broadcast %36 : vector<1x32xf32> to vector<16x32xf32>
      %38 = arith.mulf %35, %37 : vector<16x32xf32>
      %c0_23 = arith.constant 0 : index
      %c0_24 = arith.constant 0 : index
      %39 = vector.load %arg7[%c0_23, %c0_24] : memref<1x32xf32, #tpu.memory_space<vmem>>, vector<1x32xf32>
      %40 = vector.broadcast %39 : vector<1x32xf32> to vector<16x32xf32>
      %41 = arith.addf %38, %40 : vector<16x32xf32>
      %c0_25 = arith.constant 0 : index
      %c0_26 = arith.constant 0 : index
      %42 = vector.load %arg8[%c0_25, %c0_26] : memref<16x32xf32, #tpu.memory_space<vmem>>, vector<16x32xf32>
      tpu.vector_store %arg8[%c0_25, %c0_26], %41 {strides = array<i32>} : memref<16x32xf32, #tpu.memory_space<vmem>>, vector<16x32xf32>,
    } else {
    }
    return
  }
  func.func @transform_0(%arg0: i32, %arg1: i32) -> (i32, i32) {
    %c0_i32 = arith.constant 0 : i32
    return %arg0, %arg1 : i32, i32
  }
  func.func @transform_1(%arg0: i32, %arg1: i32) -> (i32, i32) {
    %c0_i32 = arith.constant 0 : i32
    %c0_i32_0 = arith.constant 0 : i32
    return %arg1, %c0_i32 : i32, i32
  }
  func.func @transform_2(%arg0: i32, %arg1: i32) -> (i32, i32) {
    %c0_i32 = arith.constant 0 : i32
    %c0_i32_0 = arith.constant 0 : i32
    %c0_i32_1 = arith.constant 0 : i32
    return %c0_i32, %c0_i32_0 : i32, i32
  }
  func.func @transform_3(%arg0: i32, %arg1: i32) -> (i32, i32) {
    %c0_i32 = arith.constant 0 : i32
    %c0_i32_0 = arith.constant 0 : i32
    return %arg0, %c0_i32 : i32, i32
  }
  func.func @transform_4(%arg0: i32, %arg1: i32) -> (i32, i32) {
    %c0_i32 = arith.constant 0 : i32
    %c0_i32_0 = arith.constant 0 : i32
    %c0_i32_1 = arith.constant 0 : i32
    return %c0_i32, %c0_i32_0 : i32, i32
  }
  func.func @transform_5(%arg0: i32, %arg1: i32) -> (i32, i32) {
    %c0_i32 = arith.constant 0 : i32
    %c0_i32_0 = arith.constant 0 : i32
    %c0_i32_1 = arith.constant 0 : i32
    return %c0_i32, %c0_i32_0 : i32, i32
  }
  func.func @transform_6(%arg0: i32, %arg1: i32) -> (i32, i32) {
    %c0_i32 = arith.constant 0 : i32
    %c0_i32_0 = arith.constant 0 : i32
    return %arg0, %c0_i32 : i32, i32
  }
}

module attributes {stable_mosaic.version = 11 : i64} {
  func.func @_matmul_bias_kernel(%arg0: i32, %arg1: i32, %arg2: i32, %arg3: memref<16x32xf32, #tpu.memory_space<vmem>>, %arg4: memref<32x64xf32, #tpu.memory_space<vmem>>, %arg5: memref<1x64xf32, #tpu.memory_space<vmem>>, %arg6: memref<16x64xf32, #tpu.memory_space<vmem>>, %arg7: memref<16x64xf32, #tpu.memory_space<vmem>>) attributes {dimension_semantics = [#tpu.dimension_semantics<parallel>, #tpu.dimension_semantics<parallel>, #tpu.dimension_semantics<arbitrary>], iteration_bounds = array<i64: 1, 1, 1>, scalar_prefetch = 0 : i64, scratch_operands = 1 : i64, tpu.core_type = #tpu.core_type<tc>, window_params = [{transform_indices = @transform_0, window_bounds = array<i64: 16, 32>}, {transform_indices = @transform_1, window_bounds = array<i64: 32, 64>}, {transform_indices = @transform_2, window_bounds = array<i64: 1, 64>}, {transform_indices = @transform_3, window_bounds = array<i64: 16, 64>}]} {
    %c0_i32 = arith.constant 0 : i32
    %0 = arith.cmpi eq, %arg2, %c0_i32 : i32
    %1 = arith.extui %0 : i1 to i32
    %c0_i32_0 = arith.constant 0 : i32
    %2 = arith.cmpi ne, %1, %c0_i32_0 : i32
    scf.if %2 {
      %cst_10 = arith.constant 0.000000e+00 : f32
      %14 = vector.broadcast %cst_10 : f32 to vector<16x64xf32>
      %c0_11 = arith.constant 0 : index
      %c0_12 = arith.constant 0 : index
      %15 = vector.load %arg7[%c0_11, %c0_12] : memref<16x64xf32, #tpu.memory_space<vmem>>, vector<16x64xf32>
      tpu.vector_store %arg7[%c0_11, %c0_12], %14 {strides = array<i32>} : memref<16x64xf32, #tpu.memory_space<vmem>>, vector<16x64xf32>,
    } else {
    }
    %c0 = arith.constant 0 : index
    %c0_1 = arith.constant 0 : index
    %3 = vector.load %arg7[%c0, %c0_1] : memref<16x64xf32, #tpu.memory_space<vmem>>, vector<16x64xf32>
    %c0_2 = arith.constant 0 : index
    %c0_3 = arith.constant 0 : index
    %4 = vector.load %arg3[%c0_2, %c0_3] : memref<16x32xf32, #tpu.memory_space<vmem>>, vector<16x32xf32>
    %5 = arith.truncf %4 : vector<16x32xf32> to vector<16x32xbf16>
    %c0_4 = arith.constant 0 : index
    %c0_5 = arith.constant 0 : index
    %6 = vector.load %arg4[%c0_4, %c0_5] : memref<32x64xf32, #tpu.memory_space<vmem>>, vector<32x64xf32>
    %7 = arith.truncf %6 : vector<32x64xf32> to vector<32x64xbf16>
    %cst = arith.constant dense<0.000000e+00> : vector<16x64xf32>
    %8 = tpu.matmul %5, %7, %cst {dimension_numbers = #tpu.dot_dimension_numbers<[1], [0], [0], [1], [0, 0, 1, 1], [], []>} : vector<16x32xbf16>, vector<32x64xbf16>, vector<16x64xf32> -> vector<16x64xf32>
    %9 = arith.addf %3, %8 : vector<16x64xf32>
    %c0_6 = arith.constant 0 : index
    %c0_7 = arith.constant 0 : index
    %10 = vector.load %arg7[%c0_6, %c0_7] : memref<16x64xf32, #tpu.memory_space<vmem>>, vector<16x64xf32>
    tpu.vector_store %arg7[%c0_6, %c0_7], %9 {strides = array<i32>} : memref<16x64xf32, #tpu.memory_space<vmem>>, vector<16x64xf32>,
    %c0_i32_8 = arith.constant 0 : i32
    %11 = arith.cmpi eq, %arg2, %c0_i32_8 : i32
    %12 = arith.extui %11 : i1 to i32
    %c0_i32_9 = arith.constant 0 : i32
    %13 = arith.cmpi ne, %12, %c0_i32_9 : i32
    scf.if %13 {
      %c0_10 = arith.constant 0 : index
      %c0_11 = arith.constant 0 : index
      %14 = vector.load %arg7[%c0_10, %c0_11] : memref<16x64xf32, #tpu.memory_space<vmem>>, vector<16x64xf32>
      %c0_12 = arith.constant 0 : index
      %c0_13 = arith.constant 0 : index
      %15 = vector.load %arg5[%c0_12, %c0_13] : memref<1x64xf32, #tpu.memory_space<vmem>>, vector<1x64xf32>
      %16 = vector.broadcast %15 : vector<1x64xf32> to vector<16x64xf32>
      %17 = arith.addf %14, %16 : vector<16x64xf32>
      %cst_14 = arith.constant 5.000000e-01 : f32
      %18 = vector.broadcast %cst_14 : f32 to vector<16x64xf32>
      %19 = arith.mulf %18, %17 : vector<16x64xf32>
      %cst_15 = arith.constant 4.471500e-02 : f32
      %20 = vector.broadcast %cst_15 : f32 to vector<16x64xf32>
      %21 = arith.mulf %20, %17 : vector<16x64xf32>
      %22 = arith.mulf %21, %17 : vector<16x64xf32>
      %23 = arith.mulf %22, %17 : vector<16x64xf32>
      %24 = arith.addf %17, %23 : vector<16x64xf32>
      %cst_16 = arith.constant 0.797884583 : f32
      %25 = vector.broadcast %cst_16 : f32 to vector<16x64xf32>
      %26 = arith.mulf %25, %24 : vector<16x64xf32>
      %27 = math.tanh %26 : vector<16x64xf32>
      %cst_17 = arith.constant 1.000000e+00 : f32
      %28 = vector.broadcast %cst_17 : f32 to vector<16x64xf32>
      %29 = arith.addf %28, %27 : vector<16x64xf32>
      %30 = arith.mulf %19, %29 : vector<16x64xf32>
      %c0_18 = arith.constant 0 : index
      %c0_19 = arith.constant 0 : index
      %31 = vector.load %arg6[%c0_18, %c0_19] : memref<16x64xf32, #tpu.memory_space<vmem>>, vector<16x64xf32>
      tpu.vector_store %arg6[%c0_18, %c0_19], %30 {strides = array<i32>} : memref<16x64xf32, #tpu.memory_space<vmem>>, vector<16x64xf32>,
    } else {
    }
    return
  }
  func.func @transform_0(%arg0: i32, %arg1: i32, %arg2: i32) -> (i32, i32) {
    %c0_i32 = arith.constant 0 : i32
    return %arg0, %arg2 : i32, i32
  }
  func.func @transform_1(%arg0: i32, %arg1: i32, %arg2: i32) -> (i32, i32) {
    %c0_i32 = arith.constant 0 : i32
    return %arg2, %arg1 : i32, i32
  }
  func.func @transform_2(%arg0: i32, %arg1: i32, %arg2: i32) -> (i32, i32) {
    %c0_i32 = arith.constant 0 : i32
    %c0_i32_0 = arith.constant 0 : i32
    return %c0_i32, %arg1 : i32, i32
  }
  func.func @transform_3(%arg0: i32, %arg1: i32, %arg2: i32) -> (i32, i32) {
    %c0_i32 = arith.constant 0 : i32
    return %arg0, %arg1 : i32, i32
  }
}

module attributes {stable_mosaic.version = 11 : i64} {
  func.func @_matmul_bias_add_ln_kernel(%arg0: i32, %arg1: i32, %arg2: memref<16x64xf32, #tpu.memory_space<vmem>>, %arg3: memref<64x32xf32, #tpu.memory_space<vmem>>, %arg4: memref<1x32xf32, #tpu.memory_space<vmem>>, %arg5: memref<16x32xf32, #tpu.memory_space<vmem>>, %arg6: memref<1x32xf32, #tpu.memory_space<vmem>>, %arg7: memref<1x32xf32, #tpu.memory_space<vmem>>, %arg8: memref<16x32xf32, #tpu.memory_space<vmem>>, %arg9: memref<16x32xf32, #tpu.memory_space<vmem>>) attributes {dimension_semantics = [#tpu.dimension_semantics<parallel>, #tpu.dimension_semantics<arbitrary>], iteration_bounds = array<i64: 1, 1>, scalar_prefetch = 0 : i64, scratch_operands = 1 : i64, tpu.core_type = #tpu.core_type<tc>, window_params = [{transform_indices = @transform_0, window_bounds = array<i64: 16, 64>}, {transform_indices = @transform_1, window_bounds = array<i64: 64, 32>}, {pipeline_mode = #tpu.pipeline_mode<synchronous>, transform_indices = @transform_2, window_bounds = array<i64: 1, 32>}, {transform_indices = @transform_3, window_bounds = array<i64: 16, 32>}, {pipeline_mode = #tpu.pipeline_mode<synchronous>, transform_indices = @transform_4, window_bounds = array<i64: 1, 32>}, {pipeline_mode = #tpu.pipeline_mode<synchronous>, transform_indices = @transform_5, window_bounds = array<i64: 1, 32>}, {transform_indices = @transform_6, window_bounds = array<i64: 16, 32>}]} {
    %c0_i32 = arith.constant 0 : i32
    %0 = arith.cmpi eq, %arg1, %c0_i32 : i32
    %1 = arith.extui %0 : i1 to i32
    %c0_i32_0 = arith.constant 0 : i32
    %2 = arith.cmpi ne, %1, %c0_i32_0 : i32
    scf.if %2 {
      %cst_10 = arith.constant 0.000000e+00 : f32
      %14 = vector.broadcast %cst_10 : f32 to vector<16x32xf32>
      %c0_11 = arith.constant 0 : index
      %c0_12 = arith.constant 0 : index
      %15 = vector.load %arg9[%c0_11, %c0_12] : memref<16x32xf32, #tpu.memory_space<vmem>>, vector<16x32xf32>
      tpu.vector_store %arg9[%c0_11, %c0_12], %14 {strides = array<i32>} : memref<16x32xf32, #tpu.memory_space<vmem>>, vector<16x32xf32>,
    } else {
    }
    %c0 = arith.constant 0 : index
    %c0_1 = arith.constant 0 : index
    %3 = vector.load %arg9[%c0, %c0_1] : memref<16x32xf32, #tpu.memory_space<vmem>>, vector<16x32xf32>
    %c0_2 = arith.constant 0 : index
    %c0_3 = arith.constant 0 : index
    %4 = vector.load %arg2[%c0_2, %c0_3] : memref<16x64xf32, #tpu.memory_space<vmem>>, vector<16x64xf32>
    %5 = arith.truncf %4 : vector<16x64xf32> to vector<16x64xbf16>
    %c0_4 = arith.constant 0 : index
    %c0_5 = arith.constant 0 : index
    %6 = vector.load %arg3[%c0_4, %c0_5] : memref<64x32xf32, #tpu.memory_space<vmem>>, vector<64x32xf32>
    %7 = arith.truncf %6 : vector<64x32xf32> to vector<64x32xbf16>
    %cst = arith.constant dense<0.000000e+00> : vector<16x32xf32>
    %8 = tpu.matmul %5, %7, %cst {dimension_numbers = #tpu.dot_dimension_numbers<[1], [0], [0], [1], [0, 0, 1, 1], [], []>} : vector<16x64xbf16>, vector<64x32xbf16>, vector<16x32xf32> -> vector<16x32xf32>
    %9 = arith.addf %3, %8 : vector<16x32xf32>
    %c0_6 = arith.constant 0 : index
    %c0_7 = arith.constant 0 : index
    %10 = vector.load %arg9[%c0_6, %c0_7] : memref<16x32xf32, #tpu.memory_space<vmem>>, vector<16x32xf32>
    tpu.vector_store %arg9[%c0_6, %c0_7], %9 {strides = array<i32>} : memref<16x32xf32, #tpu.memory_space<vmem>>, vector<16x32xf32>,
    %c0_i32_8 = arith.constant 0 : i32
    %11 = arith.cmpi eq, %arg1, %c0_i32_8 : i32
    %12 = arith.extui %11 : i1 to i32
    %c0_i32_9 = arith.constant 0 : i32
    %13 = arith.cmpi ne, %12, %c0_i32_9 : i32
    scf.if %13 {
      %c0_10 = arith.constant 0 : index
      %c0_11 = arith.constant 0 : index
      %14 = vector.load %arg9[%c0_10, %c0_11] : memref<16x32xf32, #tpu.memory_space<vmem>>, vector<16x32xf32>
      %c0_12 = arith.constant 0 : index
      %c0_13 = arith.constant 0 : index
      %15 = vector.load %arg4[%c0_12, %c0_13] : memref<1x32xf32, #tpu.memory_space<vmem>>, vector<1x32xf32>
      %16 = vector.broadcast %15 : vector<1x32xf32> to vector<16x32xf32>
      %17 = arith.addf %14, %16 : vector<16x32xf32>
      %c0_14 = arith.constant 0 : index
      %c0_15 = arith.constant 0 : index
      %18 = vector.load %arg5[%c0_14, %c0_15] : memref<16x32xf32, #tpu.memory_space<vmem>>, vector<16x32xf32>
      %19 = arith.addf %17, %18 : vector<16x32xf32>
      %cst_16 = arith.constant dense<0.000000e+00> : vector<16xf32>
      %20 = vector.multi_reduction <add>, %19, %cst_16 [1] : vector<16x32xf32> to vector<16xf32>
      %21 = vector.shape_cast %20 : vector<16xf32> to vector<16x1xf32>
      %cst_17 = arith.constant 3.200000e+01 : f32
      %22 = vector.broadcast %cst_17 : f32 to vector<16x1xf32>
      %23 = arith.divf %21, %22 : vector<16x1xf32>
      %24 = vector.broadcast %23 : vector<16x1xf32> to vector<16x32xf32>
      %25 = arith.subf %19, %24 : vector<16x32xf32>
      %26 = arith.mulf %25, %25 : vector<16x32xf32>
      %cst_18 = arith.constant dense<0.000000e+00> : vector<16xf32>
      %27 = vector.multi_reduction <add>, %26, %cst_18 [1] : vector<16x32xf32> to vector<16xf32>
      %28 = vector.shape_cast %27 : vector<16xf32> to vector<16x1xf32>
      %cst_19 = arith.constant 3.200000e+01 : f32
      %29 = vector.broadcast %cst_19 : f32 to vector<16x1xf32>
      %30 = arith.divf %28, %29 : vector<16x1xf32>
      %cst_20 = arith.constant 9.99999996E-13 : f32
      %31 = vector.broadcast %cst_20 : f32 to vector<16x1xf32>
      %32 = arith.addf %30, %31 : vector<16x1xf32>
      %33 = math.rsqrt %32 : vector<16x1xf32>
      %34 = vector.broadcast %33 : vector<16x1xf32> to vector<16x32xf32>
      %35 = arith.mulf %25, %34 : vector<16x32xf32>
      %c0_21 = arith.constant 0 : index
      %c0_22 = arith.constant 0 : index
      %36 = vector.load %arg6[%c0_21, %c0_22] : memref<1x32xf32, #tpu.memory_space<vmem>>, vector<1x32xf32>
      %37 = vector.broadcast %36 : vector<1x32xf32> to vector<16x32xf32>
      %38 = arith.mulf %35, %37 : vector<16x32xf32>
      %c0_23 = arith.constant 0 : index
      %c0_24 = arith.constant 0 : index
      %39 = vector.load %arg7[%c0_23, %c0_24] : memref<1x32xf32, #tpu.memory_space<vmem>>, vector<1x32xf32>
      %40 = vector.broadcast %39 : vector<1x32xf32> to vector<16x32xf32>
      %41 = arith.addf %38, %40 : vector<16x32xf32>
      %c0_25 = arith.constant 0 : index
      %c0_26 = arith.constant 0 : index
      %42 = vector.load %arg8[%c0_25, %c0_26] : memref<16x32xf32, #tpu.memory_space<vmem>>, vector<16x32xf32>
      tpu.vector_store %arg8[%c0_25, %c0_26], %41 {strides = array<i32>} : memref<16x32xf32, #tpu.memory_space<vmem>>, vector<16x32xf32>,
    } else {
    }
    return
  }
  func.func @transform_0(%arg0: i32, %arg1: i32) -> (i32, i32) {
    %c0_i32 = arith.constant 0 : i32
    return %arg0, %arg1 : i32, i32
  }
  func.func @transform_1(%arg0: i32, %arg1: i32) -> (i32, i32) {
    %c0_i32 = arith.constant 0 : i32
    %c0_i32_0 = arith.constant 0 : i32
    return %arg1, %c0_i32 : i32, i32
  }
  func.func @transform_2(%arg0: i32, %arg1: i32) -> (i32, i32) {
    %c0_i32 = arith.constant 0 : i32
    %c0_i32_0 = arith.constant 0 : i32
    %c0_i32_1 = arith.constant 0 : i32
    return %c0_i32, %c0_i32_0 : i32, i32
  }
  func.func @transform_3(%arg0: i32, %arg1: i32) -> (i32, i32) {
    %c0_i32 = arith.constant 0 : i32
    %c0_i32_0 = arith.constant 0 : i32
    return %arg0, %c0_i32 : i32, i32
  }
  func.func @transform_4(%arg0: i32, %arg1: i32) -> (i32, i32) {
    %c0_i32 = arith.constant 0 : i32
    %c0_i32_0 = arith.constant 0 : i32
    %c0_i32_1 = arith.constant 0 : i32
    return %c0_i32, %c0_i32_0 : i32, i32
  }
  func.func @transform_5(%arg0: i32, %arg1: i32) -> (i32, i32) {
    %c0_i32 = arith.constant 0 : i32
    %c0_i32_0 = arith.constant 0 : i32
    %c0_i32_1 = arith.constant 0 : i32
    return %c0_i32, %c0_i32_0 : i32, i32
  }
  func.func @transform_6(%arg0: i32, %arg1: i32) -> (i32, i32) {
    %c0_i32 = arith.constant 0 : i32
    %c0_i32_0 = arith.constant 0 : i32
    return %arg0, %c0_i32 : i32, i32
  }
}

module attributes {stable_mosaic.version = 11 : i64} {
  func.func @_matmul_bias_kernel(%arg0: i32, %arg1: i32, %arg2: i32, %arg3: memref<2x32xf32, #tpu.memory_space<vmem>>, %arg4: memref<32x32xf32, #tpu.memory_space<vmem>>, %arg5: memref<1x32xf32, #tpu.memory_space<vmem>>, %arg6: memref<2x32xf32, #tpu.memory_space<vmem>>, %arg7: memref<2x32xf32, #tpu.memory_space<vmem>>) attributes {dimension_semantics = [#tpu.dimension_semantics<parallel>, #tpu.dimension_semantics<parallel>, #tpu.dimension_semantics<arbitrary>], iteration_bounds = array<i64: 1, 1, 1>, scalar_prefetch = 0 : i64, scratch_operands = 1 : i64, tpu.core_type = #tpu.core_type<tc>, window_params = [{transform_indices = @transform_0, window_bounds = array<i64: 2, 32>}, {transform_indices = @transform_1, window_bounds = array<i64: 32, 32>}, {transform_indices = @transform_2, window_bounds = array<i64: 1, 32>}, {transform_indices = @transform_3, window_bounds = array<i64: 2, 32>}]} {
    %c0_i32 = arith.constant 0 : i32
    %0 = arith.cmpi eq, %arg2, %c0_i32 : i32
    %1 = arith.extui %0 : i1 to i32
    %c0_i32_0 = arith.constant 0 : i32
    %2 = arith.cmpi ne, %1, %c0_i32_0 : i32
    scf.if %2 {
      %cst_10 = arith.constant 0.000000e+00 : f32
      %14 = vector.broadcast %cst_10 : f32 to vector<2x32xf32>
      %c0_11 = arith.constant 0 : index
      %c0_12 = arith.constant 0 : index
      %15 = vector.load %arg7[%c0_11, %c0_12] : memref<2x32xf32, #tpu.memory_space<vmem>>, vector<2x32xf32>
      tpu.vector_store %arg7[%c0_11, %c0_12], %14 {strides = array<i32>} : memref<2x32xf32, #tpu.memory_space<vmem>>, vector<2x32xf32>,
    } else {
    }
    %c0 = arith.constant 0 : index
    %c0_1 = arith.constant 0 : index
    %3 = vector.load %arg7[%c0, %c0_1] : memref<2x32xf32, #tpu.memory_space<vmem>>, vector<2x32xf32>
    %c0_2 = arith.constant 0 : index
    %c0_3 = arith.constant 0 : index
    %4 = vector.load %arg3[%c0_2, %c0_3] : memref<2x32xf32, #tpu.memory_space<vmem>>, vector<2x32xf32>
    %5 = arith.truncf %4 : vector<2x32xf32> to vector<2x32xbf16>
    %c0_4 = arith.constant 0 : index
    %c0_5 = arith.constant 0 : index
    %6 = vector.load %arg4[%c0_4, %c0_5] : memref<32x32xf32, #tpu.memory_space<vmem>>, vector<32x32xf32>
    %7 = arith.truncf %6 : vector<32x32xf32> to vector<32x32xbf16>
    %cst = arith.constant dense<0.000000e+00> : vector<2x32xf32>
    %8 = tpu.matmul %5, %7, %cst {dimension_numbers = #tpu.dot_dimension_numbers<[1], [0], [0], [1], [0, 0, 1, 1], [], []>} : vector<2x32xbf16>, vector<32x32xbf16>, vector<2x32xf32> -> vector<2x32xf32>
    %9 = arith.addf %3, %8 : vector<2x32xf32>
    %c0_6 = arith.constant 0 : index
    %c0_7 = arith.constant 0 : index
    %10 = vector.load %arg7[%c0_6, %c0_7] : memref<2x32xf32, #tpu.memory_space<vmem>>, vector<2x32xf32>
    tpu.vector_store %arg7[%c0_6, %c0_7], %9 {strides = array<i32>} : memref<2x32xf32, #tpu.memory_space<vmem>>, vector<2x32xf32>,
    %c0_i32_8 = arith.constant 0 : i32
    %11 = arith.cmpi eq, %arg2, %c0_i32_8 : i32
    %12 = arith.extui %11 : i1 to i32
    %c0_i32_9 = arith.constant 0 : i32
    %13 = arith.cmpi ne, %12, %c0_i32_9 : i32
    scf.if %13 {
      %c0_10 = arith.constant 0 : index
      %c0_11 = arith.constant 0 : index
      %14 = vector.load %arg7[%c0_10, %c0_11] : memref<2x32xf32, #tpu.memory_space<vmem>>, vector<2x32xf32>
      %c0_12 = arith.constant 0 : index
      %c0_13 = arith.constant 0 : index
      %15 = vector.load %arg5[%c0_12, %c0_13] : memref<1x32xf32, #tpu.memory_space<vmem>>, vector<1x32xf32>
      %16 = vector.broadcast %15 : vector<1x32xf32> to vector<2x32xf32>
      %17 = arith.addf %14, %16 : vector<2x32xf32>
      %18 = math.tanh %17 : vector<2x32xf32>
      %c0_14 = arith.constant 0 : index
      %c0_15 = arith.constant 0 : index
      %19 = vector.load %arg6[%c0_14, %c0_15] : memref<2x32xf32, #tpu.memory_space<vmem>>, vector<2x32xf32>
      tpu.vector_store %arg6[%c0_14, %c0_15], %18 {strides = array<i32>} : memref<2x32xf32, #tpu.memory_space<vmem>>, vector<2x32xf32>,
    } else {
    }
    return
  }
  func.func @transform_0(%arg0: i32, %arg1: i32, %arg2: i32) -> (i32, i32) {
    %c0_i32 = arith.constant 0 : i32
    return %arg0, %arg2 : i32, i32
  }
  func.func @transform_1(%arg0: i32, %arg1: i32, %arg2: i32) -> (i32, i32) {
    %c0_i32 = arith.constant 0 : i32
    return %arg2, %arg1 : i32, i32
  }
  func.func @transform_2(%arg0: i32, %arg1: i32, %arg2: i32) -> (i32, i32) {
    %c0_i32 = arith.constant 0 : i32
    %c0_i32_0 = arith.constant 0 : i32
    return %c0_i32, %arg1 : i32, i32
  }
  func.func @transform_3(%arg0: i32, %arg1: i32, %arg2: i32) -> (i32, i32) {
    %c0_i32 = arith.constant 0 : i32
    return %arg0, %arg1 : i32, i32
  }
}

module attributes {stable_mosaic.version = 11 : i64} {
  func.func @_matmul_bias_kernel(%arg0: i32, %arg1: i32, %arg2: i32, %arg3: memref<2x32xf32, #tpu.memory_space<vmem>>, %arg4: memref<32x3xf32, #tpu.memory_space<vmem>>, %arg5: memref<1x3xf32, #tpu.memory_space<vmem>>, %arg6: memref<2x3xf32, #tpu.memory_space<vmem>>, %arg7: memref<2x3xf32, #tpu.memory_space<vmem>>) attributes {dimension_semantics = [#tpu.dimension_semantics<parallel>, #tpu.dimension_semantics<parallel>, #tpu.dimension_semantics<arbitrary>], iteration_bounds = array<i64: 1, 1, 1>, scalar_prefetch = 0 : i64, scratch_operands = 1 : i64, tpu.core_type = #tpu.core_type<tc>, window_params = [{transform_indices = @transform_0, window_bounds = array<i64: 2, 32>}, {transform_indices = @transform_1, window_bounds = array<i64: 32, 3>}, {transform_indices = @transform_2, window_bounds = array<i64: 1, 3>}, {transform_indices = @transform_3, window_bounds = array<i64: 2, 3>}]} {
    %c0_i32 = arith.constant 0 : i32
    %0 = arith.cmpi eq, %arg2, %c0_i32 : i32
    %1 = arith.extui %0 : i1 to i32
    %c0_i32_0 = arith.constant 0 : i32
    %2 = arith.cmpi ne, %1, %c0_i32_0 : i32
    scf.if %2 {
      %cst_10 = arith.constant 0.000000e+00 : f32
      %14 = vector.broadcast %cst_10 : f32 to vector<2x3xf32>
      %c0_11 = arith.constant 0 : index
      %c0_12 = arith.constant 0 : index
      %15 = vector.load %arg7[%c0_11, %c0_12] : memref<2x3xf32, #tpu.memory_space<vmem>>, vector<2x3xf32>
      tpu.vector_store %arg7[%c0_11, %c0_12], %14 {strides = array<i32>} : memref<2x3xf32, #tpu.memory_space<vmem>>, vector<2x3xf32>,
    } else {
    }
    %c0 = arith.constant 0 : index
    %c0_1 = arith.constant 0 : index
    %3 = vector.load %arg7[%c0, %c0_1] : memref<2x3xf32, #tpu.memory_space<vmem>>, vector<2x3xf32>
    %c0_2 = arith.constant 0 : index
    %c0_3 = arith.constant 0 : index
    %4 = vector.load %arg3[%c0_2, %c0_3] : memref<2x32xf32, #tpu.memory_space<vmem>>, vector<2x32xf32>
    %5 = arith.truncf %4 : vector<2x32xf32> to vector<2x32xbf16>
    %c0_4 = arith.constant 0 : index
    %c0_5 = arith.constant 0 : index
    %6 = vector.load %arg4[%c0_4, %c0_5] : memref<32x3xf32, #tpu.memory_space<vmem>>, vector<32x3xf32>
    %7 = arith.truncf %6 : vector<32x3xf32> to vector<32x3xbf16>
    %cst = arith.constant dense<0.000000e+00> : vector<2x3xf32>
    %8 = tpu.matmul %5, %7, %cst {dimension_numbers = #tpu.dot_dimension_numbers<[1], [0], [0], [1], [0, 0, 1, 1], [], []>} : vector<2x32xbf16>, vector<32x3xbf16>, vector<2x3xf32> -> vector<2x3xf32>
    %9 = arith.addf %3, %8 : vector<2x3xf32>
    %c0_6 = arith.constant 0 : index
    %c0_7 = arith.constant 0 : index
    %10 = vector.load %arg7[%c0_6, %c0_7] : memref<2x3xf32, #tpu.memory_space<vmem>>, vector<2x3xf32>
    tpu.vector_store %arg7[%c0_6, %c0_7], %9 {strides = array<i32>} : memref<2x3xf32, #tpu.memory_space<vmem>>, vector<2x3xf32>,
    %c0_i32_8 = arith.constant 0 : i32
    %11 = arith.cmpi eq, %arg2, %c0_i32_8 : i32
    %12 = arith.extui %11 : i1 to i32
    %c0_i32_9 = arith.constant 0 : i32
    %13 = arith.cmpi ne, %12, %c0_i32_9 : i32
    scf.if %13 {
      %c0_10 = arith.constant 0 : index
      %c0_11 = arith.constant 0 : index
      %14 = vector.load %arg7[%c0_10, %c0_11] : memref<2x3xf32, #tpu.memory_space<vmem>>, vector<2x3xf32>
      %c0_12 = arith.constant 0 : index
      %c0_13 = arith.constant 0 : index
      %15 = vector.load %arg5[%c0_12, %c0_13] : memref<1x3xf32, #tpu.memory_space<vmem>>, vector<1x3xf32>
      %16 = vector.broadcast %15 : vector<1x3xf32> to vector<2x3xf32>
      %17 = arith.addf %14, %16 : vector<2x3xf32>
      %c0_14 = arith.constant 0 : index
      %c0_15 = arith.constant 0 : index
      %18 = vector.load %arg6[%c0_14, %c0_15] : memref<2x3xf32, #tpu.memory_space<vmem>>, vector<2x3xf32>
      tpu.vector_store %arg6[%c0_14, %c0_15], %17 {strides = array<i32>} : memref<2x3xf32, #tpu.memory_space<vmem>>, vector<2x3xf32>,
    } else {
    }
    return
  }
  func.func @transform_0(%arg0: i32, %arg1: i32, %arg2: i32) -> (i32, i32) {
    %c0_i32 = arith.constant 0 : i32
    return %arg0, %arg2 : i32, i32
  }
  func.func @transform_1(%arg0: i32, %arg1: i32, %arg2: i32) -> (i32, i32) {
    %c0_i32 = arith.constant 0 : i32
    return %arg2, %arg1 : i32, i32
  }
  func.func @transform_2(%arg0: i32, %arg1: i32, %arg2: i32) -> (i32, i32) {
    %c0_i32 = arith.constant 0 : i32
    %c0_i32_0 = arith.constant 0 : i32
    return %c0_i32, %arg1 : i32, i32
  }
  func.func @transform_3(%arg0: i32, %arg1: i32, %arg2: i32) -> (i32, i32) {
    %c0_i32 = arith.constant 0 : i32
    return %arg0, %arg1 : i32, i32
  }
}

</mosaic_0001>

<bundles_post_ra>
// kernel: bert_finetune_forward.13
= control target key start
LH: loop header
LB: loop body
LE: loop exit
PB: predicated region body
PF: predicated region fallthrough
CT: control target
= control target key end

     0   :  { %vm16_vm0 = vcmask 261120   ;;  %s118_s0 = inlined_call_operand.vmem [shape: f32[16,32], index: 0, kind: input, shape index: {}]   ;;  %s119_s1 = inlined_call_operand.vmem [shape: f32[1,32], index: 1, kind: input, shape index: {}]   ;;  %s120_s2 = inlined_call_operand.vmem [shape: f32[1,32], index: 2, kind: input, shape index: {}]   ;;  %s121_s3 = inlined_call_operand.vmem [shape: f32[16,32], index: 3, kind: output, shape index: {}]  }
   0x1   :  { %v14_v0 = vld [vmem:[%s118_s0] sm:$0xff]  ;;  %v15_v1 = vld [vmem:[%s118_s0 + $0x8] sm:$0xff] }
   0x2   :  { %v17_v2 = vsel %vm16_vm0, %v14_v0, 0.0  ;;  %v20_v3 = vsel %vm16_vm0, %v15_v1, 0.0  ;;  %v68_v21 = vld [vmem:[%s119_s1] ss:$0 sm:$0xff] }
   0x3   :  { %18 = vadd.xlane.f32.xlu0 %v17_v2  ;;  %v69_v23 = vld [vmem:[%s120_s2] ss:$0 sm:$0xff] }
   0x7   :  { %21 = vadd.xlane.f32.xlu0 %v20_v3 }
  0x8c   :  { %v19_v4 = vpop.xlane.xlu0 %18 }
  0x8d   :  { %v24_v5 = vmul.f32 0.03125, %v19_v4 }
  0x8f   :  { %v26_v6 = vsub.f32 %v14_v0, %v24_v5 }
  0x90   :  { %v22_v7 = vpop.xlane.xlu0 %21 }
  0x91   :  { %v25_v8 = vmul.f32 0.03125, %v22_v7  ;;  %v28_v9 = vmul.f32 %v26_v6, %v26_v6 }
  0x93   :  { %v27_v10 = vsub.f32 %v15_v1, %v25_v8  ;;  %v30_v11 = vsel %vm16_vm0, %v28_v9, 0.0 }
  0x94   :  { %31 = vadd.xlane.f32.xlu1 %v30_v11 }
  0x95   :  { %v29_v12 = vmul.f32 %v27_v10, %v27_v10 }
  0x97   :  { %v33_v13 = vsel %vm16_vm0, %v29_v12, 0.0 }
  0x98   :  { %34 = vadd.xlane.f32.xlu1 %v33_v13 }
 0x11d   :  { %v32_v14 = vpop.xlane.xlu1 %31 }
 0x11e   :  { %v36_v15 = vmul.f32 0.03125, %v32_v14 }
 0x120   :  { %v38_v16 = vadd.f32 1e-12, %v36_v15 }
 0x121   :  { %v35_v17 = vpop.xlane.xlu1 %34 }
 0x122   :  { %70 = vrsqrt.f32 %v38_v16  ;;  %v37_v18 = vmul.f32 0.03125, %v35_v17 }
 0x124   :  { %v39_v19 = vadd.f32 1e-12, %v37_v18 }
 0x126   :  { %72 = vrsqrt.f32 %v39_v19 }
 0x12f   :  { %v71_v20 = vpop.eup %70 }
 0x130   :  { %v42_v22 = vmul.f32 %v71_v20, %v26_v6 }
 0x132   :  { %v51_v24 = vmul.f32 %v68_v21, %v42_v22 }
 0x133   :  { %v73_v25 = vpop.eup %72 }
 0x134   :  { %v60_v26 = vadd.f32 %v69_v23, %v51_v24  ;;  %v43_v27 = vmul.f32 %v73_v25, %v27_v10 }
 0x136   :  { %62 = vst.msk [vmem:[%s121_s3] sm:$0xff] %vm16_vm0, %v60_v26  ;;  %v52_v28 = vmul.f32 %v68_v21, %v43_v27 }
 0x138   :  { %v61_v29 = vadd.f32 %v69_v23, %v52_v28 }
 0x13a   :  { %63 = vst.msk [vmem:[%s121_s3 + $0x8] sm:$0xff] %vm16_vm0, %v61_v29 }

// kernel: bert_finetune_forward.14
= control target key start
LH: loop header
LB: loop body
LE: loop exit
PB: predicated region body
PF: predicated region fallthrough
CT: control target
= control target key end

     0   :  { %vm19_vm0 = vcmask 785408   ;;  %v118_v0 = vmov 0.0   ;;  %vm119_vm1 = vmmov 0   ;;  %vm33_vm2 = vcmask 261120   ;;  %s173_s1 = inlined_call_operand.vmem [shape: f32[32,96], index: 1, kind: input, shape index: {}]   ;;  %s174_s0 = inlined_call_operand.vmem [shape: f32[16,32], index: 0, kind: input, shape index: {}]   ;;  %s175_s2 = inlined_call_operand.vmem [shape: f32[1,96], index: 2, kind: input, shape index: {}]   ;;  %s176_s3 = inlined_call_operand.vmem [shape: f32[16,96], index: 3, kind: output, shape index: {}]  }
   0x1   :  { %108 = vmatprep.subr.bf16.mxu0 %v118_v0  ;;  %v29_v1 = vld [vmem:[%s173_s1 + $0x10] sm:$0xff]  ;;  %v30_v2 = vld [vmem:[%s173_s1 + $0x18] sm:$0xff]  ;;  %v27_v3 = vld [vmem:[%s173_s1] sm:$0xff]  ;;  %112 = vmatprep.mubr.msk.bf16.mxu0 %vm119_vm1, %v118_v0  ;;  %20 = vst.msk [vmem:[#allocation2] sm:$0xff] %vm19_vm0, %v118_v0 }
   0x2   :  { %21 = vst.msk [vmem:[#allocation2 + $0x8] sm:$0xff] %vm19_vm0, %v118_v0  ;;  %v32_v4 = vpack.c.bf16 %v30_v2, %v29_v1  ;;  %v28_v5 = vld [vmem:[%s173_s1 + $0x8] sm:$0xff]  ;;  %v24_v7 = vld [vmem:[%s174_s0] sm:$0xff] }
   0x3   :  { %v31_v6 = vpack.c.bf16 %v28_v5, %v27_v3  ;;  %v25_v8 = vld [vmem:[%s174_s0 + $0x8] sm:$0xff]  ;;  %v104_v18 = vld [vmem:[%s175_s2] ss:$0 sm:$0xff] }
   0x4   :  { %109 = vmatpush3.bf16.msra.mxu0 %v32_v4  ;;  %v26_v9 = vpack.c.bf16 %v25_v8, %v24_v7 }
   0x5   :  { %110 = vmatprep.subr.bf16.mxu0 %v118_v0 }
   0x8   :  { %111 = vmatpush3.bf16.msra.mxu0 %v31_v6  ;;  %v22_v10 = vld [vmem:[#allocation2] sm:$0xff] }
   0x9   :  { %v23_v14 = vld [vmem:[#allocation2 + $0x8] sm:$0xff] }
   0xb   :  { %113 = vmatmul.mubr.msk.bf16.vlgmr.msra.gmra.mxu0 %vm33_vm2, %v26_v9 }
  0xcb   :  { %v71_v11 = vpop.f32.mrf.mxu0 }
  0xcc   :  { %v78_v12 = vadd.f32 %v71_v11, %v22_v10 }
  0xcd   :  { %v114_v13 = vpop.f32.mrf.mxu0 }
  0xce   :  { %81 = vst.msk [vmem:[#allocation2] sm:$0xff] %vm19_vm0, %v78_v12 }
  0xcf   :  { %v74_v15 = vpop.f32.mrf.mxu0 }
  0xd0   :  { %v79_v16 = vadd.f32 %v74_v15, %v23_v14 }
  0xd1   :  { %v115_v17 = vpop.f32.mrf.mxu0 }
  0xd2   :  { %82 = vst.msk [vmem:[#allocation2 + $0x8] sm:$0xff] %vm19_vm0, %v79_v16 }
  0xd5   :  { %v86_v19 = vld [vmem:[#allocation2] sm:$0xff] }
  0xd6   :  { %v95_v20 = vadd.f32 %v104_v18, %v86_v19 }
  0xd8   :  { %97 = vst.msk [vmem:[%s176_s3] sm:$0xff] %vm19_vm0, %v95_v20 }
  0xd9   :  { %v87_v21 = vld [vmem:[#allocation2 + $0x8] sm:$0xff] }
  0xda   :  { %v96_v22 = vadd.f32 %v104_v18, %v87_v21 }
  0xdc   :  { %98 = vst.msk [vmem:[%s176_s3 + $0x8] sm:$0xff] %vm19_vm0, %v96_v22 }

// kernel: bert_finetune_forward.16
= control target key start
LH: loop header
LB: loop body
LE: loop exit
PB: predicated region body
PF: predicated region fallthrough
CT: control target
= control target key end

     0   :  { %vm28_vm0 = vcmask 261120   ;;  %v181_v0 = vmov 0.0   ;;  %vm182_vm1 = vmmov 0   ;;  %s268_s1 = inlined_call_operand.vmem [shape: f32[32,32], index: 1, kind: input, shape index: {}]   ;;  %s269_s0 = inlined_call_operand.vmem [shape: f32[16,32], index: 0, kind: input, shape index: {}]   ;;  %s270_s2 = inlined_call_operand.vmem [shape: f32[1,32], index: 2, kind: input, shape index: {}]   ;;  %s271_s3 = inlined_call_operand.vmem [shape: f32[16,32], index: 3, kind: input, shape index: {}]   ;;  %s272_s4 = inlined_call_operand.vmem [shape: f32[1,32], index: 4, kind: input, shape index: {}]   ;;  %s273_s5 = inlined_call_operand.vmem [shape: f32[1,32], index: 5, kind: input, shape index: {}]   ;;  %s274_s6 = inlined_call_operand.vmem [shape: f32[16,32], index: 6, kind: output, shape index: {}]  }
   0x1   :  { %167 = vmatprep.subr.bf16.mxu0 %v181_v0  ;;  %v38_v1 = vld [vmem:[%s268_s1 + $0x10] sm:$0xff]  ;;  %v39_v2 = vld [vmem:[%s268_s1 + $0x18] sm:$0xff]  ;;  %v36_v3 = vld [vmem:[%s268_s1] sm:$0xff]  ;;  %171 = vmatprep.mubr.msk.bf16.mxu0 %vm182_vm1, %v181_v0  ;;  %29 = vst.msk [vmem:[#allocation2] sm:$0xff] %vm28_vm0, %v181_v0 }
   0x2   :  { %30 = vst.msk [vmem:[#allocation2 + $0x8] sm:$0xff] %vm28_vm0, %v181_v0  ;;  %v41_v4 = vpack.c.bf16 %v39_v2, %v38_v1  ;;  %v37_v5 = vld [vmem:[%s268_s1 + $0x8] sm:$0xff]  ;;  %v33_v7 = vld [vmem:[%s269_s0] sm:$0xff] }
   0x3   :  { %v40_v6 = vpack.c.bf16 %v37_v5, %v36_v3  ;;  %v34_v8 = vld [vmem:[%s269_s0 + $0x8] sm:$0xff]  ;;  %v161_v18 = vld [vmem:[%s270_s2] ss:$0 sm:$0xff] }
   0x4   :  { %168 = vmatpush3.bf16.msra.mxu0 %v41_v4  ;;  %v35_v9 = vpack.c.bf16 %v34_v8, %v33_v7  ;;  %v105_v20 = vld [vmem:[%s271_s3] sm:$0xff]  ;;  %v106_v24 = vld [vmem:[%s271_s3 + $0x8] sm:$0xff] }
   0x5   :  { %169 = vmatprep.subr.bf16.mxu0 %v181_v0  ;;  %v162_v46 = vld [vmem:[%s272_s4] ss:$0 sm:$0xff] }
   0x6   :  { %v163_v48 = vld [vmem:[%s273_s5] ss:$0 sm:$0xff] }
   0x8   :  { %170 = vmatpush3.bf16.msra.mxu0 %v40_v6  ;;  %v31_v10 = vld [vmem:[#allocation2] sm:$0xff] }
   0x9   :  { %v32_v14 = vld [vmem:[#allocation2 + $0x8] sm:$0xff] }
   0xb   :  { %172 = vmatmul.mubr.msk.bf16.vlgmr.msra.gmra.mxu0 %vm28_vm0, %v35_v9 }
  0xcb   :  { %v80_v11 = vpop.f32.mrf.mxu0 }
  0xcc   :  { %v87_v12 = vadd.f32 %v80_v11, %v31_v10 }
  0xcd   :  { %v173_v13 = vpop.f32.mrf.mxu0 }
  0xce   :  { %89 = vst.msk [vmem:[#allocation2] sm:$0xff] %vm28_vm0, %v87_v12 }
  0xcf   :  { %v83_v15 = vpop.f32.mrf.mxu0 }
  0xd0   :  { %v88_v16 = vadd.f32 %v83_v15, %v32_v14 }
  0xd1   :  { %v174_v17 = vpop.f32.mrf.mxu0 }
  0xd2   :  { %90 = vst.msk [vmem:[#allocation2 + $0x8] sm:$0xff] %vm28_vm0, %v88_v16 }
  0xd5   :  { %v94_v19 = vld [vmem:[#allocation2] sm:$0xff] }
  0xd6   :  { %v103_v21 = vadd.f32 %v161_v18, %v94_v19 }
  0xd8   :  { %v107_v22 = vadd.f32 %v105_v20, %v103_v21 }
  0xd9   :  { %v95_v23 = vld [vmem:[#allocation2 + $0x8] sm:$0xff] }
  0xda   :  { %v109_v25 = vsel %vm28_vm0, %v107_v22, 0.0  ;;  %v104_v26 = vadd.f32 %v161_v18, %v95_v23 }
  0xdb   :  { %110 = vadd.xlane.f32.xlu0 %v109_v25 }
  0xdc   :  { %v108_v27 = vadd.f32 %v106_v24, %v104_v26 }
  0xde   :  { %v112_v28 = vsel %vm28_vm0, %v108_v27, 0.0 }
  0xdf   :  { %113 = vadd.xlane.f32.xlu0 %v112_v28 }
 0x164   :  { %v111_v29 = vpop.xlane.xlu0 %110 }
 0x165   :  { %v116_v30 = vmul.f32 0.03125, %v111_v29 }
 0x167   :  { %v118_v31 = vsub.f32 %v107_v22, %v116_v30 }
 0x168   :  { %v114_v32 = vpop.xlane.xlu0 %113 }
 0x169   :  { %v117_v33 = vmul.f32 0.03125, %v114_v32  ;;  %v120_v34 = vmul.f32 %v118_v31, %v118_v31 }
 0x16b   :  { %v119_v35 = vsub.f32 %v108_v27, %v117_v33  ;;  %v122_v36 = vsel %vm28_vm0, %v120_v34, 0.0 }
 0x16c   :  { %123 = vadd.xlane.f32.xlu1 %v122_v36 }
 0x16d   :  { %v121_v37 = vmul.f32 %v119_v35, %v119_v35 }
 0x16f   :  { %v125_v38 = vsel %vm28_vm0, %v121_v37, 0.0 }
 0x170   :  { %126 = vadd.xlane.f32.xlu1 %v125_v38 }
 0x1f5   :  { %v124_v39 = vpop.xlane.xlu1 %123 }
 0x1f6   :  { %v128_v40 = vmul.f32 0.03125, %v124_v39 }
 0x1f8   :  { %v130_v41 = vadd.f32 1e-12, %v128_v40 }
 0x1f9   :  { %v127_v42 = vpop.xlane.xlu1 %126 }
 0x1fa   :  { %177 = vrsqrt.f32 %v130_v41  ;;  %v129_v43 = vmul.f32 0.03125, %v127_v42 }
 0x1fc   :  { %v131_v44 = vadd.f32 1e-12, %v129_v43 }
 0x1fe   :  { %179 = vrsqrt.f32 %v131_v44 }
 0x207   :  { %v178_v45 = vpop.eup %177 }
 0x208   :  { %v134_v47 = vmul.f32 %v178_v45, %v118_v31 }
 0x20a   :  { %v143_v49 = vmul.f32 %v162_v46, %v134_v47 }
 0x20b   :  { %v180_v50 = vpop.eup %179 }
 0x20c   :  { %v152_v51 = vadd.f32 %v163_v48, %v143_v49  ;;  %v135_v52 = vmul.f32 %v180_v50, %v119_v35 }
 0x20e   :  { %154 = vst.msk [vmem:[%s274_s6] sm:$0xff] %vm28_vm0, %v152_v51  ;;  %v144_v53 = vmul.f32 %v162_v46, %v135_v52 }
 0x210   :  { %v153_v54 = vadd.f32 %v163_v48, %v144_v53 }
 0x212   :  { %155 = vst.msk [vmem:[%s274_s6 + $0x8] sm:$0xff] %vm28_vm0, %v153_v54 }

// kernel: bert_finetune_forward.15
= control target key start
LH: loop header
LB: loop body
LE: loop exit
PB: predicated region body
PF: predicated region fallthrough
CT: control target
= control target key end

     0   :  { %s835_s15 = smov 0   ;;  %s837_s16 = smov 0   ;;  %s901_s0 = inlined_call_operand.vmem [shape: f32[2,2,8,16], index: 0, kind: input, shape index: {}]   ;;  %s902_s1 = inlined_call_operand.vmem [shape: f32[2,2,16,8], index: 1, kind: input, shape index: {}]   ;;  %s903_s2 = inlined_call_operand.vmem [shape: f32[2,2,8,16], index: 2, kind: input, shape index: {}]   ;;  %s904_s3 = inlined_call_operand.vmem [shape: f32[2,1,1,8], index: 3, kind: input, shape index: {}]   ;;  %s905_s4 = inlined_call_operand.vmem [shape: f32[2,2,8,16], index: 4, kind: output, shape index: {}]  }
   0x1   :  { %s839_s17 = smov 0  }
   0x2 LB: > { %s26_s18 = sadd.s32 1, %s802_s16  ;;  %p698_p0 = scmp.ge.s32.totalorder %s806_s17, 1  ;;  %s806_s17 = sphi %s839_s17, %s14_s17   ;;  %s802_s16 = sphi %s837_s16, %s907_s16   ;;  %s798_s15 = sphi %s835_s15, %s906_s15  }
   0x3   : > { %p28_p1 = scmp.ge.s32.totalorder %s26_s18, 2  ;;  %p226_p2 = scmp.lt.s32.totalorder %s806_s17, 3 }
   0x5   : > { %s909_s18 = smov (%p28_p1, %s26_s18), 0  ;;  %p227_p3 = pnand %p698_p0, %p226_p2 }
   0x6   : > { %p283_p4 = scmp.lt.s32.totalorder (!%p227_p3), %s798_s15, 1 }
   0x7   : > { %230 = sbr.rel (%p227_p3) target bundleno = 735 (0x2df), region = 36 }
   0xc   : > { %v808_v0 = vmov 0.0   ;;  %s911_s15 = smov (!%p283_p4, %s798_s15), 1  ;;  %vm809_vm0 = vmmov 0   ;;  %vm341_vm1 = vcmask 130048   ;;  %vm439_vm2 = vcmask 64512  }
   0xd   : > { %726 = vmatprep.subr.bf16.mxu0 %v808_v0  ;;  %732 = vmatprep.subr.bf16.mxu1 %v808_v0  ;;  %s715_s19 = sshll.u32 %s911_s15, 5  ;;  %s859_s20 = sshll.u32 %s911_s15, 4  ;;  %vm467_vm3 = vcmask 1043456  }
   0xe   : > { %728 = vmatprep.mubr.msk.bf16.mxu0 %vm809_vm0, %v808_v0  ;;  %734 = vmatprep.mubr.msk.bf16.mxu1 %vm809_vm0, %v808_v0  ;;  %s301_s23 = scalar_lea.vmem %s902_s1, %s715_s19  ;;  %s290_s26 = scalar_lea.vmem %s901_s0, %s859_s20 }
   0xf   : > { %v331_v1 = vld [vmem:[%s301_s23] sm:$0xff]  ;;  %v332_v2 = vld [vmem:[%s301_s23 + $0x8] sm:$0xff]  ;;  %v333_v3 = vld [vmem:[%s301_s23 + $0x10] sm:$0xff]  ;;  %s315_s29 = scalar_lea.vmem %s904_s3, %s911_s15  ;;  %s311_s6 = scalar_lea.vmem %s903_s2, %s859_s20 }
  0x10   : > { %v335_v4 = vpack.c.bf16 %v332_v2, %v331_v1  ;;  %v334_v5 = vld [vmem:[%s301_s23 + $0x18] sm:$0xff]  ;;  %v327_v6 = vld [vmem:[%s290_s26] sm:$0xff]  ;;  %v328_v7 = vld [vmem:[%s290_s26 + $0x8] sm:$0xff]  ;;  %s324_s9 = scalar_lea.vmem %s905_s4, %s859_s20 }
  0x11   : > { %v336_v8 = vpack.c.bf16 %v334_v5, %v333_v3  ;;  %v329_v9 = vpack.c.bf16 %v327_v6, %v327_v6  ;;  %v330_v10 = vpack.c.bf16 %v328_v7, %v328_v7  ;;  %v709_v12 = vld [vmem:[%s315_s29] ss:$0 sm:$0xff]  ;;  %v338_v37 = vld [vmem:[%s311_s6 + $0x8] sm:$0xff] }
  0x12   : > { %727 = vmatpush3.bf16.msra.mxu0 %v335_v4  ;;  %v337_v36 = vld [vmem:[%s311_s6] sm:$0xff]  ;;  %v340_v39 = vpack.c.bf16 %v338_v37, %v338_v37 }
  0x13   : > { %733 = vmatpush3.bf16.msra.mxu1 %v336_v8  ;;  %738 = vmatprep.subr.bf16.mxu0 %v808_v0  ;;  %v339_v38 = vpack.c.bf16 %v337_v36, %v337_v36 }
  0x14   : > { %744 = vmatprep.subr.bf16.mxu1 %v808_v0  ;;  %v515_v41 = vsel %vm467_vm3, %v340_v39, 0 }
  0x15   : > { %729 = vmatmul.mubr.msk.bf16.vlgmr.msra.gmra.mxu0 %vm341_vm1, %v329_v9  ;;  %v469_v40 = vsel %vm467_vm3, %v339_v38, 0 }
  0x16   : > { %735 = vmatmul.mubr.msk.bf16.vlgmr.msra.gmra.mxu1 %vm341_vm1, %v330_v10  ;;  %740 = vmatprep.mubr.msk.bf16.mxu0 %vm809_vm0, %v808_v0 }
  0x17   : > { %746 = vmatprep.mubr.msk.bf16.mxu1 %vm809_vm0, %v808_v0  ;;  %739 = vmatpush3.bf16.msra.mxu0 %v469_v40 }
  0x18   : > { %745 = vmatpush3.bf16.msra.mxu1 %v515_v41 }
  0xd5   : > { %v379_v11 = vpop.f32.mrf.mxu0 }
  0xd6   : > { %v428_v13 = vmul.f32 0.25, %v379_v11  ;;  %v422_v14 = vpop.f32.mrf.mxu1 }
  0xd7   : > { %v429_v15 = vmul.f32 0.25, %v422_v14  ;;  %v730_v16 = vpop.f32.mrf.mxu0 }
  0xd8   : > { %v736_v17 = vpop.f32.mrf.mxu1  ;;  %v437_v18 = vadd.f32 %v709_v12, %v428_v13 }
  0xd9   : > { %v382_v19 = vpop.f32.mrf.mxu0  ;;  %v438_v20 = vadd.f32 %v709_v12, %v429_v15 }
  0xda   : > { %v425_v21 = vpop.f32.mrf.mxu1  ;;  %v440_v22 = vsel %vm439_vm2, %v437_v18, -inf }
  0xdb   : > { %441 = vmax.xlane.f32.xlu0 %v440_v22  ;;  %v731_v23 = vpop.f32.mrf.mxu0  ;;  %v443_v25 = vsel %vm439_vm2, %v438_v20, -inf }
  0xdc   : > { %v737_v24 = vpop.f32.mrf.mxu1 }
  0xdf   : > { %444 = vmax.xlane.f32.xlu0 %v443_v25 }
 0x164   : > { %v442_v26 = vpop.xlane.xlu0 %441 }
 0x165   : > { %v446_v27 = vsub.f32 %v437_v18, %v442_v26 }
 0x167   : > { %v448_v28 = vmul.f32 1.442695, %v446_v27 }
 0x168   : > { %v445_v29 = vpop.xlane.xlu0 %444 }
 0x169   : > { %776 = vpow2.f32 %v448_v28  ;;  %v447_v30 = vsub.f32 %v438_v20, %v445_v29 }
 0x16b   : > { %v450_v31 = vmul.f32 1.442695, %v447_v30 }
 0x16d   : > { %778 = vpow2.f32 %v450_v31 }
 0x176   : > { %v777_v32 = vpop.eup %776 }
 0x177   : > { %v452_v33 = vsel %vm439_vm2, %v777_v32, 0.0 }
 0x178   : > { %453 = vadd.xlane.f32.xlu1 %v452_v33 }
 0x17a   : > { %v779_v34 = vpop.eup %778 }
 0x17b   : > { %v455_v35 = vsel %vm439_vm2, %v779_v34, 0.0 }
 0x17c   : > { %456 = vadd.xlane.f32.xlu1 %v455_v35 }
 0x201   : > { %v454_v42 = vpop.xlane.xlu1 %453 }
 0x202   : > { %780 = vrcp.f32 %v454_v42 }
 0x205   : > { %v457_v43 = vpop.xlane.xlu1 %456 }
 0x206   : > { %782 = vrcp.f32 %v457_v43 }
 0x20f   : > { %v781_v44 = vpop.eup %780 }
 0x210   : > { %v460_v45 = vmul.f32 %v781_v44, %v777_v32 }
 0x212   : > { %v462_v46 = vpack.c.bf16 %v460_v45, %v460_v45 }
 0x213   : > { %v783_v47 = vpop.eup %782 }
 0x214   : > { %741 = vmatmul.mubr.msk.bf16.vlgmr.msra.gmra.mxu0 %vm439_vm2, %v462_v46  ;;  %v461_v48 = vmul.f32 %v783_v47, %v779_v34 }
 0x216   : > { %v463_v49 = vpack.c.bf16 %v461_v48, %v461_v48 }
 0x218   : > { %747 = vmatmul.mubr.msk.bf16.vlgmr.msra.gmra.mxu1 %vm439_vm2, %v463_v49 }
 0x2d4   : > { %v505_v50 = vpop.f32.mrf.mxu0 }
 0x2d5   : > { %557 = vst.msk [vmem:[%s324_s9] sm:$0xff] %vm341_vm1, %v505_v50 }
 0x2d6   : > { %v742_v51 = vpop.f32.mrf.mxu0 }
 0x2d8   : > { %v508_v52 = vpop.f32.mrf.mxu0  ;;  %v551_v53 = vpop.f32.mrf.mxu1 }
 0x2d9   : > { %558 = vst.msk [vmem:[%s324_s9 + $0x8] sm:$0xff] %vm341_vm1, %v551_v53 }
 0x2da   : > { %v743_v54 = vpop.f32.mrf.mxu0  ;;  %v748_v55 = vpop.f32.mrf.mxu1 }
 0x2dc   : > { %v554_v56 = vpop.f32.mrf.mxu1 }
 0x2de   : > { %v749_v57 = vpop.f32.mrf.mxu1 }
 0x2df PF: > { %s14_s17 = sadd.s32 1, %s806_s17   ;;  %s906_s15 = smov %s802_s16 }
 0x2e0   : > { %p11_p5 = scmp.ge.s32.totalorder %s14_s17, 4   ;;  %s907_s16 = smov %s909_s18 }
 0x2e2   :  { %13 = sbr.rel (!%p11_p5) target bundleno = 2 (0x2), region = 75 }

// kernel: bert_finetune_forward.17
= control target key start
LH: loop header
LB: loop body
LE: loop exit
PB: predicated region body
PF: predicated region fallthrough
CT: control target
= control target key end

     0   :  { %vm19_vm0 = vcmask 523264   ;;  %v140_v0 = vmov 0.0   ;;  %vm141_vm1 = vmmov 0   ;;  %vm33_vm2 = vcmask 261120   ;;  %s195_s1 = inlined_call_operand.vmem [shape: f32[32,64], index: 1, kind: input, shape index: {}]   ;;  %s196_s0 = inlined_call_operand.vmem [shape: f32[16,32], index: 0, kind: input, shape index: {}]   ;;  %s197_s2 = inlined_call_operand.vmem [shape: f32[1,64], index: 2, kind: input, shape index: {}]   ;;  %s198_s3 = inlined_call_operand.vmem [shape: f32[16,64], index: 3, kind: output, shape index: {}]  }
   0x1   :  { %126 = vmatprep.subr.bf16.mxu0 %v140_v0  ;;  %v29_v1 = vld [vmem:[%s195_s1 + $0x10] sm:$0xff]  ;;  %v30_v2 = vld [vmem:[%s195_s1 + $0x18] sm:$0xff]  ;;  %v27_v3 = vld [vmem:[%s195_s1] sm:$0xff]  ;;  %130 = vmatprep.mubr.msk.bf16.mxu0 %vm141_vm1, %v140_v0  ;;  %20 = vst.msk [vmem:[#allocation2] sm:$0xff] %vm19_vm0, %v140_v0 }
   0x2   :  { %21 = vst.msk [vmem:[#allocation2 + $0x8] sm:$0xff] %vm19_vm0, %v140_v0  ;;  %v32_v4 = vpack.c.bf16 %v30_v2, %v29_v1  ;;  %v28_v5 = vld [vmem:[%s195_s1 + $0x8] sm:$0xff]  ;;  %v24_v7 = vld [vmem:[%s196_s0] sm:$0xff] }
   0x3   :  { %v31_v6 = vpack.c.bf16 %v28_v5, %v27_v3  ;;  %v25_v8 = vld [vmem:[%s196_s0 + $0x8] sm:$0xff]  ;;  %v122_v18 = vld [vmem:[%s197_s2] ss:$0 sm:$0xff] }
   0x4   :  { %127 = vmatpush3.bf16.msra.mxu0 %v32_v4  ;;  %v26_v9 = vpack.c.bf16 %v25_v8, %v24_v7 }
   0x5   :  { %128 = vmatprep.subr.bf16.mxu0 %v140_v0 }
   0x8   :  { %129 = vmatpush3.bf16.msra.mxu0 %v31_v6  ;;  %v22_v10 = vld [vmem:[#allocation2] sm:$0xff] }
   0x9   :  { %v23_v14 = vld [vmem:[#allocation2 + $0x8] sm:$0xff] }
   0xb   :  { %131 = vmatmul.mubr.msk.bf16.vlgmr.msra.gmra.mxu0 %vm33_vm2, %v26_v9 }
  0xcb   :  { %v71_v11 = vpop.f32.mrf.mxu0 }
  0xcc   :  { %v78_v12 = vadd.f32 %v71_v11, %v22_v10 }
  0xcd   :  { %v132_v13 = vpop.f32.mrf.mxu0 }
  0xce   :  { %81 = vst.msk [vmem:[#allocation2] sm:$0xff] %vm19_vm0, %v78_v12 }
  0xcf   :  { %v74_v15 = vpop.f32.mrf.mxu0 }
  0xd0   :  { %v79_v16 = vadd.f32 %v74_v15, %v23_v14 }
  0xd1   :  { %v133_v17 = vpop.f32.mrf.mxu0 }
  0xd2   :  { %82 = vst.msk [vmem:[#allocation2 + $0x8] sm:$0xff] %vm19_vm0, %v79_v16 }
  0xd5   :  { %v86_v19 = vld [vmem:[#allocation2] sm:$0xff] }
  0xd6   :  { %v95_v20 = vadd.f32 %v122_v18, %v86_v19 }
  0xd8   :  { %v99_v21 = vmul.f32 0.044715, %v95_v20  ;;  %v97_v34 = vmul.f32 0.5, %v95_v20 }
  0xd9   :  { %v87_v22 = vld [vmem:[#allocation2 + $0x8] sm:$0xff] }
  0xda   :  { %v101_v23 = vmul.f32 %v99_v21, %v95_v20  ;;  %v96_v24 = vadd.f32 %v122_v18, %v87_v22 }
  0xdc   :  { %v103_v25 = vmul.f32 %v101_v23, %v95_v20  ;;  %v100_v26 = vmul.f32 0.044715, %v96_v24  ;;  %v98_v38 = vmul.f32 0.5, %v96_v24 }
  0xde   :  { %v105_v27 = vadd.f32 %v103_v25, %v95_v20  ;;  %v102_v28 = vmul.f32 %v100_v26, %v96_v24 }
  0xe0   :  { %v107_v29 = vmul.f32 0.7978846, %v105_v27  ;;  %v104_v30 = vmul.f32 %v102_v28, %v96_v24 }
  0xe2   :  { %136 = vtanh.f32 %v107_v29  ;;  %v106_v31 = vadd.f32 %v104_v30, %v96_v24 }
  0xe4   :  { %v108_v32 = vmul.f32 0.7978846, %v106_v31 }
  0xe6   :  { %138 = vtanh.f32 %v108_v32 }
  0xef   :  { %v137_v33 = vpop.eup %136 }
  0xf0   :  { %v111_v35 = vadd.f32 1.0, %v137_v33 }
  0xf2   :  { %v113_v36 = vmul.f32 %v111_v35, %v97_v34 }
  0xf3   :  { %v139_v37 = vpop.eup %138 }
  0xf4   :  { %115 = vst.msk [vmem:[%s198_s3] sm:$0xff] %vm19_vm0, %v113_v36  ;;  %v112_v39 = vadd.f32 1.0, %v139_v37 }
  0xf6   :  { %v114_v40 = vmul.f32 %v112_v39, %v98_v38 }
  0xf8   :  { %116 = vst.msk [vmem:[%s198_s3 + $0x8] sm:$0xff] %vm19_vm0, %v114_v40 }

// kernel: bert_finetune_forward.24
= control target key start
LH: loop header
LB: loop body
LE: loop exit
PB: predicated region body
PF: predicated region fallthrough
CT: control target
= control target key end

     0   :  { %vm19_vm0 = vcmask 254976   ;;  %v112_v0 = vmov 0.0   ;;  %vm113_vm1 = vmmov 0   ;;  %vm30_vm2 = vcmask 261120   ;;  %s158_s1 = inlined_call_operand.vmem [shape: f32[32,32], index: 1, kind: input, shape index: {}]   ;;  %s159_s0 = inlined_call_operand.vmem [shape: f32[2,32], index: 0, kind: input, shape index: {}]   ;;  %s160_s2 = inlined_call_operand.vmem [shape: f32[1,32], index: 2, kind: input, shape index: {}]   ;;  %s161_s3 = inlined_call_operand.vmem [shape: f32[2,32], index: 3, kind: output, shape index: {}]  }
   0x1   :  { %20 = vst.msk [vmem:[#allocation2] sm:$0x3] %vm19_vm0, %v112_v0  ;;  %100 = vmatprep.subr.bf16.mxu0 %v112_v0  ;;  %v26_v1 = vld [vmem:[%s158_s1 + $0x10] sm:$0xff]  ;;  %v27_v2 = vld [vmem:[%s158_s1 + $0x18] sm:$0xff]  ;;  %v24_v3 = vld [vmem:[%s158_s1] sm:$0xff]  ;;  %104 = vmatprep.mubr.msk.bf16.mxu0 %vm113_vm1, %v112_v0 }
   0x2   :  { %v29_v4 = vpack.c.bf16 %v27_v2, %v26_v1  ;;  %v25_v5 = vld [vmem:[%s158_s1 + $0x8] sm:$0xff]  ;;  %v22_v7 = vld [vmem:[%s159_s0] sm:$0x3] }
   0x3   :  { %v28_v6 = vpack.c.bf16 %v25_v5, %v24_v3  ;;  %v23_v8 = vpack.c.bf16 %v22_v7, %v22_v7  ;;  %v96_v15 = vld [vmem:[%s160_s2] ss:$0 sm:$0xff] }
   0x4   :  { %101 = vmatpush3.bf16.msra.mxu0 %v29_v4 }
   0x5   :  { %102 = vmatprep.subr.bf16.mxu0 %v112_v0 }
   0x8   :  { %103 = vmatpush3.bf16.msra.mxu0 %v28_v6  ;;  %v21_v9 = vld [vmem:[#allocation2] sm:$0x3] }
   0xb   :  { %105 = vmatmul.mubr.msk.bf16.vlgmr.msra.gmra.mxu0 %vm30_vm2, %v23_v8 }
  0xcb   :  { %v68_v10 = vpop.f32.mrf.mxu0 }
  0xcc   :  { %v74_v11 = vadd.f32 %v68_v10, %v21_v9 }
  0xcd   :  { %v106_v12 = vpop.f32.mrf.mxu0 }
  0xce   :  { %76 = vst.msk [vmem:[#allocation2] sm:$0x3] %vm19_vm0, %v74_v11 }
  0xcf   :  { %v71_v13 = vpop.f32.mrf.mxu0 }
  0xd1   :  { %v107_v14 = vpop.f32.mrf.mxu0 }
  0xd5   :  { %v80_v16 = vld [vmem:[#allocation2] sm:$0x3] }
  0xd6   :  { %v88_v17 = vadd.f32 %v96_v15, %v80_v16 }
  0xd8   :  { %110 = vtanh.f32 %v88_v17 }
  0xe5   :  { %v111_v18 = vpop.eup %110 }
  0xe6   :  { %90 = vst.msk [vmem:[%s161_s3] sm:$0x3] %vm19_vm0, %v111_v18 }

// kernel: bert_finetune_forward.25
= control target key start
LH: loop header
LB: loop body
LE: loop exit
PB: predicated region body
PF: predicated region fallthrough
CT: control target
= control target key end

     0   :  { %v143_v3 = vmov 0.0   ;;  %vm144_vm0 = vmmov 0   ;;  %vm20_vm1 = vcmask 17408   ;;  %s190_s0 = inlined_call_operand.vmem [shape: f32[2,32], index: 0, kind: input, shape index: {}]   ;;  %s191_s1 = inlined_call_operand.vmem [shape: f32[32,3], index: 1, kind: input, shape index: {}]   ;;  %s192_s2 = inlined_call_operand.vmem [shape: f32[1,3], index: 2, kind: input, shape index: {}]   ;;  %s193_s3 = inlined_call_operand.hbm [shape: f32[2,3], index: 3, kind: output, shape index: {}]  }
   0x1   :  { %v27_v0 = vld [vmem:[%s191_s1 + $0x10] sm:$0xff]  ;;  %v28_v1 = vld [vmem:[%s191_s1 + $0x18] sm:$0xff]  ;;  %v25_v2 = vld [vmem:[%s191_s1] sm:$0xff]  ;;  %110 = vmatprep.subr.bf16.mxu0 %v143_v3  ;;  %114 = vmatprep.mubr.msk.bf16.mxu0 %vm144_vm0, %v143_v3 }
   0x2   :  { %v30_v4 = vpack.c.bf16 %v28_v1, %v27_v0  ;;  %v26_v5 = vld [vmem:[%s191_s1 + $0x8] sm:$0xff] }
   0x3   :  { %8 = vsyncpa [#allocation4], 0  ;;  %21 = vst.msk [vmem:[#allocation2] sm:$0x3] %vm20_vm1, %v143_v3  ;;  %v29_v6 = vpack.c.bf16 %v26_v5, %v25_v2  ;;  %v23_v7 = vld [vmem:[%s190_s0] sm:$0x3] }
   0x4   :  { %111 = vmatpush3.bf16.msra.mxu0 %v30_v4  ;;  %v24_v8 = vpack.c.bf16 %v23_v7, %v23_v7  ;;  %vm31_vm2 = vcmask 261120   ;;  %v106_v15 = vld [vmem:[%s192_s2] ss:$0 sm:$0xff]  ;;  %s145_s23 = smov [#allocation3]  }
   0x5   :  { %112 = vmatprep.subr.bf16.mxu0 %v143_v3  ;;  %s97_s24 = sshll.u32 %s145_s23, 4  ;;  %s98_s24 = int_to_ptr.vmem [resolvable:$true] %s97_s24 }
   0x6   :  { %s121_s0 = scalar_lea.vmem %s98_s24, 32  ;;  %p126_p1 = scmp.lt.s32.totalorder %s98_s24, %s98_s24 }
   0x7   :  { %p122_p0 = scmp.ne.s32.totalorder %s98_s24, %s121_s0  ;;  %p127_p2 = scmp.lt.s32.totalorder %s121_s0, %s121_s0 }
   0x8   :  { %113 = vmatpush3.bf16.msra.mxu0 %v29_v6 }
   0x9   :  { %p128_p3 = por %p127_p2, %p126_p1 }
   0xa   :  { %v22_v9 = vld [vmem:[#allocation2] sm:$0x3] }
   0xb   :  { %115 = vmatmul.mubr.msk.bf16.vlgmr.msra.gmra.mxu0 %vm31_vm2, %v24_v8  ;;  %p129_p4 = pnand %p128_p3, %p122_p0 }
  0xcb   :  { %v69_v10 = vpop.f32.mrf.mxu0 }
  0xcc   :  { %v75_v11 = vadd.f32 %v69_v10, %v22_v9 }
  0xcd   :  { %v116_v12 = vpop.f32.mrf.mxu0 }
  0xce   :  { %77 = vst.msk [vmem:[#allocation2] sm:$0x3] %vm20_vm1, %v75_v11 }
  0xcf   :  { %v72_v13 = vpop.f32.mrf.mxu0 }
  0xd1   :  { %v117_v14 = vpop.f32.mrf.mxu0 }
  0xd5   :  { %v81_v16 = vld [vmem:[#allocation2] sm:$0x3] }
  0xd6   :  { %v89_v17 = vadd.f32 %v106_v15, %v81_v16 }
  0xd8   :  { %90 = vst.msk [vmem:[#allocation3] sm:$0x3] %vm20_vm1, %v89_v17 }
  0xd9   :  { %132 = shalt.err (!%p129_p4)
}
  0xda   :  { %100 = dma.vmem_to_hbm [thread:$0]  %s98_s24, 32, %s193_s3, [#allocation4]  }
  0xdb   :  { %141 = dma.done.wait [#allocation4], 32  }
  0xdc   :  { %142 = vsyncadd [#allocation4], 4294967264 }
  0xdd   :  { %104 = vsyncpa [#allocation4], 1 }

// kernel: bert_finetune_forward.18
= control target key start
LH: loop header
LB: loop body
LE: loop exit
PB: predicated region body
PF: predicated region fallthrough
CT: control target
= control target key end

     0   :  { %vm28_vm0 = vcmask 261120   ;;  %v194_v0 = vmov 0.0   ;;  %vm195_vm1 = vmmov 0   ;;  %vm48_vm2 = vcmask 523264   ;;  %s292_s1 = inlined_call_operand.vmem [shape: f32[64,32], index: 1, kind: input, shape index: {}]   ;;  %s293_s0 = inlined_call_operand.vmem [shape: f32[16,64], index: 0, kind: input, shape index: {}]   ;;  %s294_s2 = inlined_call_operand.vmem [shape: f32[1,32], index: 2, kind: input, shape index: {}]   ;;  %s295_s3 = inlined_call_operand.vmem [shape: f32[16,32], index: 3, kind: input, shape index: {}]   ;;  %s296_s4 = inlined_call_operand.vmem [shape: f32[1,32], index: 4, kind: input, shape index: {}]   ;;  %s297_s5 = inlined_call_operand.vmem [shape: f32[1,32], index: 5, kind: input, shape index: {}]   ;;  %s298_s6 = inlined_call_operand.vmem [shape: f32[16,32], index: 6, kind: output, shape index: {}]  }
   0x1   :  { %176 = vmatprep.subr.bf16.mxu0 %v194_v0  ;;  %v42_v1 = vld [vmem:[%s292_s1 + $0x30] sm:$0xff]  ;;  %v43_v2 = vld [vmem:[%s292_s1 + $0x38] sm:$0xff]  ;;  %v40_v3 = vld [vmem:[%s292_s1 + $0x20] sm:$0xff]  ;;  %184 = vmatprep.mubr.msk.bf16.mxu0 %vm195_vm1, %v194_v0  ;;  %29 = vst.msk [vmem:[#allocation2] sm:$0xff] %vm28_vm0, %v194_v0 }
   0x2   :  { %30 = vst.msk [vmem:[#allocation2 + $0x8] sm:$0xff] %vm28_vm0, %v194_v0  ;;  %v47_v4 = vpack.c.bf16 %v43_v2, %v42_v1  ;;  %v41_v5 = vld [vmem:[%s292_s1 + $0x28] sm:$0xff]  ;;  %v38_v7 = vld [vmem:[%s292_s1 + $0x10] sm:$0xff]  ;;  %v39_v8 = vld [vmem:[%s292_s1 + $0x18] sm:$0xff] }
   0x3   :  { %v46_v6 = vpack.c.bf16 %v41_v5, %v40_v3  ;;  %v45_v9 = vpack.c.bf16 %v39_v8, %v38_v7  ;;  %v36_v10 = vld [vmem:[%s292_s1] sm:$0xff]  ;;  %v37_v11 = vld [vmem:[%s292_s1 + $0x8] sm:$0xff] }
   0x4   :  { %177 = vmatpush3.bf16.msra.mxu0 %v47_v4  ;;  %v44_v12 = vpack.c.bf16 %v37_v11, %v36_v10  ;;  %v33_v13 = vld [vmem:[%s293_s0] sm:$0xff]  ;;  %v34_v14 = vld [vmem:[%s293_s0 + $0x8] sm:$0xff] }
   0x5   :  { %178 = vmatprep.subr.bf16.mxu0 %v194_v0  ;;  %v35_v15 = vpack.c.bf16 %v34_v14, %v33_v13  ;;  %v168_v24 = vld [vmem:[%s294_s2] ss:$0 sm:$0xff]  ;;  %v113_v30 = vld [vmem:[%s295_s3 + $0x8] sm:$0xff] }
   0x6   :  { %v112_v26 = vld [vmem:[%s295_s3] sm:$0xff] }
   0x7   :  { %v169_v52 = vld [vmem:[%s296_s4] ss:$0 sm:$0xff] }
   0x8   :  { %179 = vmatpush3.bf16.msra.mxu0 %v46_v6  ;;  %v31_v16 = vld [vmem:[#allocation2] sm:$0xff] }
   0x9   :  { %180 = vmatprep.subr.bf16.mxu0 %v194_v0  ;;  %v32_v20 = vld [vmem:[#allocation2 + $0x8] sm:$0xff]  ;;  %v170_v54 = vld [vmem:[%s297_s5] ss:$0 sm:$0xff] }
   0xc   :  { %181 = vmatpush3.bf16.msra.mxu0 %v45_v9 }
   0xd   :  { %182 = vmatprep.subr.bf16.mxu0 %v194_v0 }
  0x10   :  { %183 = vmatpush3.bf16.msra.mxu0 %v44_v12 }
  0x13   :  { %185 = vmatmul.mubr.msk.bf16.vlgmr.msra.gmra.mxu0 %vm48_vm2, %v35_v15 }
  0xd3   :  { %v86_v17 = vpop.f32.mrf.mxu0 }
  0xd4   :  { %v93_v18 = vadd.f32 %v86_v17, %v31_v16 }
  0xd5   :  { %v186_v19 = vpop.f32.mrf.mxu0 }
  0xd6   :  { %96 = vst.msk [vmem:[#allocation2] sm:$0xff] %vm28_vm0, %v93_v18 }
  0xd7   :  { %v89_v21 = vpop.f32.mrf.mxu0 }
  0xd8   :  { %v94_v22 = vadd.f32 %v89_v21, %v32_v20 }
  0xd9   :  { %v187_v23 = vpop.f32.mrf.mxu0 }
  0xda   :  { %97 = vst.msk [vmem:[#allocation2 + $0x8] sm:$0xff] %vm28_vm0, %v94_v22 }
  0xdd   :  { %v101_v25 = vld [vmem:[#allocation2] sm:$0xff] }
  0xde   :  { %v110_v27 = vadd.f32 %v168_v24, %v101_v25 }
  0xe0   :  { %v114_v28 = vadd.f32 %v112_v26, %v110_v27 }
  0xe1   :  { %v102_v29 = vld [vmem:[#allocation2 + $0x8] sm:$0xff] }
  0xe2   :  { %v116_v31 = vsel %vm28_vm0, %v114_v28, 0.0  ;;  %v111_v32 = vadd.f32 %v168_v24, %v102_v29 }
  0xe3   :  { %117 = vadd.xlane.f32.xlu0 %v116_v31 }
  0xe4   :  { %v115_v33 = vadd.f32 %v113_v30, %v111_v32 }
  0xe6   :  { %v119_v34 = vsel %vm28_vm0, %v115_v33, 0.0 }
  0xe7   :  { %120 = vadd.xlane.f32.xlu0 %v119_v34 }
 0x16c   :  { %v118_v35 = vpop.xlane.xlu0 %117 }
 0x16d   :  { %v123_v36 = vmul.f32 0.03125, %v118_v35 }
 0x16f   :  { %v125_v37 = vsub.f32 %v114_v28, %v123_v36 }
 0x170   :  { %v121_v38 = vpop.xlane.xlu0 %120 }
 0x171   :  { %v124_v39 = vmul.f32 0.03125, %v121_v38  ;;  %v127_v40 = vmul.f32 %v125_v37, %v125_v37 }
 0x173   :  { %v126_v41 = vsub.f32 %v115_v33, %v124_v39  ;;  %v129_v42 = vsel %vm28_vm0, %v127_v40, 0.0 }
 0x174   :  { %130 = vadd.xlane.f32.xlu1 %v129_v42 }
 0x175   :  { %v128_v43 = vmul.f32 %v126_v41, %v126_v41 }
 0x177   :  { %v132_v44 = vsel %vm28_vm0, %v128_v43, 0.0 }
 0x178   :  { %133 = vadd.xlane.f32.xlu1 %v132_v44 }
 0x1fd   :  { %v131_v45 = vpop.xlane.xlu1 %130 }
 0x1fe   :  { %v135_v46 = vmul.f32 0.03125, %v131_v45 }
 0x200   :  { %v137_v47 = vadd.f32 1e-12, %v135_v46 }
 0x201   :  { %v134_v48 = vpop.xlane.xlu1 %133 }
 0x202   :  { %190 = vrsqrt.f32 %v137_v47  ;;  %v136_v49 = vmul.f32 0.03125, %v134_v48 }
 0x204   :  { %v138_v50 = vadd.f32 1e-12, %v136_v49 }
 0x206   :  { %192 = vrsqrt.f32 %v138_v50 }
 0x20f   :  { %v191_v51 = vpop.eup %190 }
 0x210   :  { %v141_v53 = vmul.f32 %v191_v51, %v125_v37 }
 0x212   :  { %v150_v55 = vmul.f32 %v169_v52, %v141_v53 }
 0x213   :  { %v193_v56 = vpop.eup %192 }
 0x214   :  { %v159_v57 = vadd.f32 %v170_v54, %v150_v55  ;;  %v142_v58 = vmul.f32 %v193_v56, %v126_v41 }
 0x216   :  { %161 = vst.msk [vmem:[%s298_s6] sm:$0xff] %vm28_vm0, %v159_v57  ;;  %v151_v59 = vmul.f32 %v169_v52, %v142_v58 }
 0x218   :  { %v160_v60 = vadd.f32 %v170_v54, %v151_v59 }
 0x21a   :  { %162 = vst.msk [vmem:[%s298_s6 + $0x8] sm:$0xff] %vm28_vm0, %v160_v60 }

</bundles_post_ra>
